<compile_context>
chip_gen: v5e
topology: v5e:2x2
jax: 0.10.0
libtpu: 0.0.40
codegen_flags: <defaults>
</compile_context>

<pallas_src>
import functools

import jax
import jax.numpy as jnp
from jax.experimental import pallas as pl
from jax.experimental.pallas import tpu as pltpu


def _attention_kernel(feat_l_ref, feat_r_ref,
                      norm_w_ref, norm_b_ref,
                      l_pw_ref, l_pb_ref,
                      r_pw_ref, r_pb_ref,
                      l_ow_ref, l_ob_ref,
                      r_ow_ref, r_ob_ref,
                      out_l_ref, out_r_ref,
                      *, num_heads):
    B, W, C = feat_l_ref.shape           # static block shape
    hd = C // num_heads

    # Flatten the batch-block for all row-wise (batch-agnostic) matmuls.
    xl = feat_l_ref[...].reshape(B * W, C)
    xr = feat_r_ref[...].reshape(B * W, C)

    gamma = norm_w_ref[0]                # (C,)
    beta = norm_b_ref[0]                 # (C,)

    def layernorm(x):                    # f32 VPU/EUP math (v5e-safe)
        mu = jnp.mean(x, axis=-1, keepdims=True)
        var = jnp.mean(jnp.square(x - mu), axis=-1, keepdims=True)
        return (x - mu) * jax.lax.rsqrt(var + 1e-5) * gamma + beta

    lk_n = layernorm(xl).astype(jnp.bfloat16)    # bf16 only at MXU boundary
    rk_n = layernorm(xr).astype(jnp.bfloat16)

    # kv projections: weights pre-transposed to (C, 2C) and pre-cast to bf16
    # in the wrapper; accumulation stays f32.
    l_proj = jnp.dot(lk_n, l_pw_ref[...],
                     preferred_element_type=jnp.float32) + l_pb_ref[0]
    r_proj = jnp.dot(rk_n, r_pw_ref[...],
                     preferred_element_type=jnp.float32) + r_pb_ref[0]

    # bf16 K/V for the attention contractions (MXU operands).
    l_k = l_proj[:, :C].reshape(B, W, C).astype(jnp.bfloat16)
    l_v = l_proj[:, C:].reshape(B, W, C).astype(jnp.bfloat16)
    r_k = r_proj[:, :C].reshape(B, W, C).astype(jnp.bfloat16)
    r_v = r_proj[:, C:].reshape(B, W, C).astype(jnp.bfloat16)

    rv_heads = []
    lv_heads = []
    for h in range(num_heads):           # short static unroll over heads
        sl = slice(h * hd, (h + 1) * hd)
        lkh, rkh = l_k[:, :, sl], r_k[:, :, sl]     # (B, W, hd) bf16
        lvh, rvh = l_v[:, :, sl], r_v[:, :, sl]

        # attn[b, q, k] = <l_k[b, q], r_k[b, k]> * 0.1   (batched over the block)
        attn = jnp.einsum('bqd,bkd->bqk', lkh, rkh,
                          preferred_element_type=jnp.float32) * 0.1

        # Softmax over right positions (axis=-1): left queries gather right.
        m_l = jnp.max(attn, axis=-1, keepdims=True)
        e_l = jnp.exp(attn - m_l)
        s_l = jnp.sum(e_l, axis=-1, keepdims=True)
        sm_l = (e_l * pl.reciprocal(s_l, approx=True)).astype(jnp.bfloat16)

        # Softmax over left positions (axis=1) == softmax(attn.T, -1).T,
        # consumed below through a trans-a contraction (no explicit transpose).
        m_c = jnp.max(attn, axis=1, keepdims=True)
        e_c = jnp.exp(attn - m_c)
        s_c = jnp.sum(e_c, axis=1, keepdims=True)
        sm_c = (e_c * pl.reciprocal(s_c, approx=True)).astype(jnp.bfloat16)

        # left output gathers right values
        rv_heads.append(jnp.einsum('bqk,bkd->bqd', sm_l, rvh,
                                   preferred_element_type=jnp.float32))
        # right output gathers left values (trans-a contraction, no attn.T)
        lv_heads.append(jnp.einsum('bqk,bqd->bkd', sm_c, lvh,
                                   preferred_element_type=jnp.float32))

    rv_attn = jnp.concatenate(rv_heads, axis=-1).reshape(B * W, C)
    lv_attn = jnp.concatenate(lv_heads, axis=-1).reshape(B * W, C)

    # Output projections (weights pre-transposed to (C, C), bf16) + residual.
    rv_out = jnp.dot(rv_attn.astype(jnp.bfloat16), l_ow_ref[...],
                     preferred_element_type=jnp.float32) + l_ob_ref[0]
    lv_out = jnp.dot(lv_attn.astype(jnp.bfloat16), r_ow_ref[...],
                     preferred_element_type=jnp.float32) + r_ob_ref[0]

    out_l_ref[...] = (xl + rv_out).reshape(B, W, C).astype(out_l_ref.dtype)
    out_r_ref[...] = (xr + lv_out).reshape(B, W, C).astype(out_r_ref.dtype)


def _vmem_capacity_bytes():
    """Per-core VMEM capacity; conservative (v7x-safe) fallback if unknown."""
    try:
        info = pltpu.get_tpu_info()
        cap = getattr(info, "vmem_capacity_bytes", None)
        if cap:
            return int(cap)
    except Exception:
        pass
    return 64 * 1024 * 1024


def _estimate_vmem_bytes(block_b, w, C, num_heads):
    """Rough peak f32/bf16 VMEM footprint of one grid step (incl. pipelining)."""
    BW = block_b * w
    f32, bf16 = 4, 2
    # Pipelined HBM<->VMEM blocks: 2 inputs + 2 outputs, double-buffered.
    feat_io = 4 * 2 * BW * C * f32
    # Resident weights/biases (bf16 weights), double-buffered by the pipeline.
    weights = 2 * (2 * C * 2 * C * bf16 + 2 * C * C * bf16 + 8 * C * f32)
    # Row-wise intermediates: layernorm outs, bf16 casts, kv projections,
    # bf16 K/V, per-head output lists + concat + out-proj results.
    rowwise = (2 * BW * C * f32 + 2 * BW * C * bf16
               + 2 * BW * 2 * C * f32 + 4 * BW * C * bf16
               + 6 * BW * C * f32)
    # Per-head score working set (attn + exps + bf16 probs, live at once).
    scores = block_b * w * w * (3 * f32 + 2 * bf16)
    return feat_io + weights + rowwise + scores


def _pick_block_b(bh, w, C, num_heads, budget, cap=64):
    """Largest divisor of bh that fits the budget, capped at bh//2 so the
    'parallel' grid axis always has >= 2 steps (keeps both v7x TCs busy)."""
    max_b = max(1, min(bh // 2, cap))
    best = 1
    for d in range(1, max_b + 1):
        if bh % d == 0 and _estimate_vmem_bytes(d, w, C, num_heads) <= budget:
            best = d
    return best


def attention_layer_pallas(feat_left, feat_right, params, num_heads, block_b=None):
    bh, w, C = feat_left.shape

    vmem_cap = _vmem_capacity_bytes()
    working_budget = int(0.5 * vmem_cap)          # headroom for compiler scratch
    vmem_limit = int(0.75 * vmem_cap)

    if block_b is None:
        block_b = _pick_block_b(bh, w, C, num_heads, working_budget)
    assert bh % block_b == 0, "block_b must divide bh"
    grid = (bh // block_b,)

    # 1-D params passed as (1, N) so they live cleanly in VMEM (f32 biases).
    norm_w = params["norm_w"].reshape(1, C)
    norm_b = params["norm_b"].reshape(1, C)
    l_pb = params["l_pb"].reshape(1, 2 * C)
    r_pb = params["r_pb"].reshape(1, 2 * C)
    l_ob = params["l_ob"].reshape(1, C)
    r_ob = params["r_ob"].reshape(1, C)

    # Pre-transpose weights once outside the kernel (F.linear does x @ W.T) and
    # pre-cast to bf16 so the MXU gets native-rate operands and weight DMA halves.
    l_pw_t = params["l_pw"].T.astype(jnp.bfloat16)     # (C, 2C)
    r_pw_t = params["r_pw"].T.astype(jnp.bfloat16)     # (C, 2C)
    l_ow_t = params["l_ow"].T.astype(jnp.bfloat16)     # (C, C)
    r_ow_t = params["r_ow"].T.astype(jnp.bfloat16)     # (C, C)

    feat_spec = pl.BlockSpec((block_b, w, C), lambda b: (b, 0, 0))

    def rep(shape):                      # replicated (constant-index) blocks
        return pl.BlockSpec(shape, lambda b: (0, 0))

    kernel = functools.partial(_attention_kernel, num_heads=num_heads)

    out_left, out_right = pl.pallas_call(
        kernel,
        out_shape=(
            jax.ShapeDtypeStruct((bh, w, C), feat_left.dtype),
            jax.ShapeDtypeStruct((bh, w, C), feat_right.dtype),
        ),
        grid_spec=pltpu.PrefetchScalarGridSpec(
            num_scalar_prefetch=0,
            grid=grid,
            in_specs=[
                feat_spec,                   # feat_left block
                feat_spec,                   # feat_right block
                rep((1, C)),                 # norm weight
                rep((1, C)),                 # norm bias
                rep((C, 2 * C)),             # l_proj_weight (pre-T, bf16)
                rep((1, 2 * C)),             # l_proj_bias
                rep((C, 2 * C)),             # r_proj_weight (pre-T, bf16)
                rep((1, 2 * C)),             # r_proj_bias
                rep((C, C)),                 # l_out_proj weight (pre-T, bf16)
                rep((1, C)),                 # l_out_proj bias
                rep((C, C)),                 # r_out_proj weight (pre-T, bf16)
                rep((1, C)),                 # r_out_proj bias
            ],
            out_specs=[feat_spec, feat_spec],
        ),
        compiler_params=pltpu.CompilerParams(
            dimension_semantics=("parallel",),
            vmem_limit_bytes=vmem_limit),
    )(feat_left, feat_right,
      norm_w, norm_b,
      l_pw_t, l_pb,
      r_pw_t, r_pb,
      l_ow_t, l_ob,
      r_ow_t, r_ob)
    return out_left, out_right


def attention_layer_ref(feat_left, feat_right, params, num_heads):
    """Pure-JAX f32 reference mirroring the PyTorch forward."""
    bh, w, C = feat_left.shape
    hd = C // num_heads

    def ln(x):
        mu = x.mean(-1, keepdims=True)
        var = ((x - mu) ** 2).mean(-1, keepdims=True)
        return (x - mu) / jnp.sqrt(var + 1e-5) * params["norm_w"] + params["norm_b"]

    lkn, rkn = ln(feat_left), ln(feat_right)
    lp = lkn @ params["l_pw"].T + params["l_pb"]
    rp = rkn @ params["r_pw"].T + params["r_pb"]
    l_k, l_v = lp[..., :C], lp[..., C:]
    r_k, r_v = rp[..., :C], rp[..., C:]
    l_k = l_k.reshape(bh, w, num_heads, hd)
    r_k = r_k.reshape(bh, w, num_heads, hd)
    l_v = l_v.reshape(bh, w, num_heads, hd)
    r_v = r_v.reshape(bh, w, num_heads, hd)

    attn = jnp.einsum('nwec,nvec->newv', l_k, r_k) * 0.1
    sm_l = jax.nn.softmax(attn, axis=-1)
    rv = jnp.einsum('newv,nvec->nwec', sm_l, r_v).reshape(bh, w, C)
    sm_r = jax.nn.softmax(jnp.swapaxes(attn, -1, -2), axis=-1)
    lv = jnp.einsum('nevw,nwec->nvec', sm_r, l_v).reshape(bh, w, C)

    rv = rv @ params["l_ow"].T + params["l_ob"]
    lv = lv @ params["r_ow"].T + params["r_ob"]
    return feat_left + rv, feat_right + lv


def make_params(key, hidden_dim):
    C = hidden_dim

    def xavier_uniform(k, shape):
        fan_out, fan_in = shape
        bound = (6.0 / (fan_in + fan_out)) ** 0.5
        return jax.random.uniform(k, shape, jnp.float32, -bound, bound)

    k0, k1, k2, k3 = jax.random.split(key, 4)
    return {
        "norm_w": jnp.ones((C,), jnp.float32),
        "norm_b": jnp.zeros((C,), jnp.float32),
        "l_pw": xavier_uniform(k0, (2 * C, C)),
        "l_pb": jnp.zeros((2 * C,), jnp.float32),
        "r_pw": xavier_uniform(k1, (2 * C, C)),
        "r_pb": jnp.zeros((2 * C,), jnp.float32),
        # NonDynamicallyQuantizableLinear weights: deterministic synthetic init
        "l_ow": xavier_uniform(k2, (C, C)),
        "l_ob": jnp.zeros((C,), jnp.float32),
        "r_ow": xavier_uniform(k3, (C, C)),
        "r_ob": jnp.zeros((C,), jnp.float32),
    }


if __name__ == "__main__":
    bh, w, hidden_dim, nhead = 8, 8, 32, 4   # bh = batch*height

    key = jax.random.PRNGKey(0)
    kp, kl, kr = jax.random.split(key, 3)
    params = make_params(kp, hidden_dim)
    feat_left = jax.random.normal(kl, (bh, w, hidden_dim), jnp.float32)
    feat_right = jax.random.normal(kr, (bh, w, hidden_dim), jnp.float32)

    ref_l, ref_r = attention_layer_ref(feat_left, feat_right, params, nhead)

    # bf16 MXU operands with f32 accumulation -> relax tolerances vs f32 ref.
    ATOL = RTOL = 5e-2

    # Explicit small block (4 grid steps) to exercise batch-block tiling.
    out_l, out_r = attention_layer_pallas(feat_left, feat_right, params, nhead,
                                          block_b=2)
    jax.block_until_ready((out_l, out_r))
    assert jnp.allclose(out_l, ref_l, atol=ATOL, rtol=RTOL), "left output mismatch"
    assert jnp.allclose(out_r, ref_r, atol=ATOL, rtol=RTOL), "right output mismatch"

    # Auto-picked block size (capped at bh//2 -> >= 2 grid steps for megacore).
    out_l2, out_r2 = attention_layer_pallas(feat_left, feat_right, params, nhead)
    jax.block_until_ready((out_l2, out_r2))
    assert jnp.allclose(out_l2, ref_l, atol=ATOL, rtol=RTOL), \
        "left output mismatch (auto block)"
    assert jnp.allclose(out_r2, ref_r, atol=ATOL, rtol=RTOL), \
        "right output mismatch (auto block)"

    print("KERNEL_OK")
</pallas_src>

<mosaic_0001>
module attributes {stable_mosaic.version = 11 : i64} {
  func.func @_attention_kernel(%arg0: i32, %arg1: memref<2x8x32xf32, #tpu.memory_space<vmem>>, %arg2: memref<2x8x32xf32, #tpu.memory_space<vmem>>, %arg3: memref<1x32xf32, #tpu.memory_space<vmem>>, %arg4: memref<1x32xf32, #tpu.memory_space<vmem>>, %arg5: memref<32x64xbf16, #tpu.memory_space<vmem>>, %arg6: memref<1x64xf32, #tpu.memory_space<vmem>>, %arg7: memref<32x64xbf16, #tpu.memory_space<vmem>>, %arg8: memref<1x64xf32, #tpu.memory_space<vmem>>, %arg9: memref<32x32xbf16, #tpu.memory_space<vmem>>, %arg10: memref<1x32xf32, #tpu.memory_space<vmem>>, %arg11: memref<32x32xbf16, #tpu.memory_space<vmem>>, %arg12: memref<1x32xf32, #tpu.memory_space<vmem>>, %arg13: memref<2x8x32xf32, #tpu.memory_space<vmem>>, %arg14: memref<2x8x32xf32, #tpu.memory_space<vmem>>) attributes {dimension_semantics = [#tpu.dimension_semantics<parallel>], iteration_bounds = array<i64: 4>, scalar_prefetch = 0 : i64, scratch_operands = 0 : i64, tpu.core_type = #tpu.core_type<tc>, window_params = [{transform_indices = @transform_0, window_bounds = array<i64: 2, 8, 32>}, {transform_indices = @transform_1, window_bounds = array<i64: 2, 8, 32>}, {pipeline_mode = #tpu.pipeline_mode<synchronous>, transform_indices = @transform_2, window_bounds = array<i64: 1, 32>}, {pipeline_mode = #tpu.pipeline_mode<synchronous>, transform_indices = @transform_3, window_bounds = array<i64: 1, 32>}, {pipeline_mode = #tpu.pipeline_mode<synchronous>, transform_indices = @transform_4, window_bounds = array<i64: 32, 64>}, {pipeline_mode = #tpu.pipeline_mode<synchronous>, transform_indices = @transform_5, window_bounds = array<i64: 1, 64>}, {pipeline_mode = #tpu.pipeline_mode<synchronous>, transform_indices = @transform_6, window_bounds = array<i64: 32, 64>}, {pipeline_mode = #tpu.pipeline_mode<synchronous>, transform_indices = @transform_7, window_bounds = array<i64: 1, 64>}, {pipeline_mode = #tpu.pipeline_mode<synchronous>, transform_indices = @transform_8, window_bounds = array<i64: 32, 32>}, {pipeline_mode = #tpu.pipeline_mode<synchronous>, transform_indices = @transform_9, window_bounds = array<i64: 1, 32>}, {pipeline_mode = #tpu.pipeline_mode<synchronous>, transform_indices = @transform_10, window_bounds = array<i64: 32, 32>}, {pipeline_mode = #tpu.pipeline_mode<synchronous>, transform_indices = @transform_11, window_bounds = array<i64: 1, 32>}, {transform_indices = @transform_12, window_bounds = array<i64: 2, 8, 32>}, {transform_indices = @transform_13, window_bounds = array<i64: 2, 8, 32>}]} {
    %c0 = arith.constant 0 : index
    %c0_0 = arith.constant 0 : index
    %c0_1 = arith.constant 0 : index
    %0 = vector.load %arg1[%c0, %c0_0, %c0_1] : memref<2x8x32xf32, #tpu.memory_space<vmem>>, vector<2x8x32xf32>
    %1 = vector.shape_cast %0 : vector<2x8x32xf32> to vector<16x32xf32>
    %c0_2 = arith.constant 0 : index
    %c0_3 = arith.constant 0 : index
    %c0_4 = arith.constant 0 : index
    %2 = vector.load %arg2[%c0_2, %c0_3, %c0_4] : memref<2x8x32xf32, #tpu.memory_space<vmem>>, vector<2x8x32xf32>
    %3 = vector.shape_cast %2 : vector<2x8x32xf32> to vector<16x32xf32>
    %c0_5 = arith.constant 0 : index
    %c0_6 = arith.constant 0 : index
    %4 = vector.load %arg3[%c0_5, %c0_6] : memref<1x32xf32, #tpu.memory_space<vmem>>, vector<1x32xf32>
    %5 = vector.shape_cast %4 : vector<1x32xf32> to vector<32xf32>
    %c0_7 = arith.constant 0 : index
    %c0_8 = arith.constant 0 : index
    %6 = vector.load %arg4[%c0_7, %c0_8] : memref<1x32xf32, #tpu.memory_space<vmem>>, vector<1x32xf32>
    %7 = vector.shape_cast %6 : vector<1x32xf32> to vector<32xf32>
    %cst = arith.constant dense<0.000000e+00> : vector<16xf32>
    %8 = vector.multi_reduction <add>, %1, %cst [1] : vector<16x32xf32> to vector<16xf32>
    %9 = vector.shape_cast %8 : vector<16xf32> to vector<16x1xf32>
    %cst_9 = arith.constant 3.200000e+01 : f32
    %10 = vector.broadcast %cst_9 : f32 to vector<16x1xf32>
    %11 = arith.divf %9, %10 : vector<16x1xf32>
    %12 = vector.broadcast %11 : vector<16x1xf32> to vector<16x32xf32>
    %13 = arith.subf %1, %12 : vector<16x32xf32>
    %14 = arith.mulf %13, %13 : vector<16x32xf32>
    %cst_10 = arith.constant dense<0.000000e+00> : vector<16xf32>
    %15 = vector.multi_reduction <add>, %14, %cst_10 [1] : vector<16x32xf32> to vector<16xf32>
    %16 = vector.shape_cast %15 : vector<16xf32> to vector<16x1xf32>
    %cst_11 = arith.constant 3.200000e+01 : f32
    %17 = vector.broadcast %cst_11 : f32 to vector<16x1xf32>
    %18 = arith.divf %16, %17 : vector<16x1xf32>
    %19 = vector.broadcast %11 : vector<16x1xf32> to vector<16x32xf32>
    %20 = arith.subf %1, %19 : vector<16x32xf32>
    %cst_12 = arith.constant 9.99999974E-6 : f32
    %21 = vector.broadcast %cst_12 : f32 to vector<16x1xf32>
    %22 = arith.addf %18, %21 : vector<16x1xf32>
    %23 = math.rsqrt %22 : vector<16x1xf32>
    %24 = vector.broadcast %23 : vector<16x1xf32> to vector<16x32xf32>
    %25 = arith.mulf %20, %24 : vector<16x32xf32>
    %26 = vector.shape_cast %5 : vector<32xf32> to vector<1x32xf32>
    %27 = vector.broadcast %26 : vector<1x32xf32> to vector<16x32xf32>
    %28 = arith.mulf %25, %27 : vector<16x32xf32>
    %29 = vector.shape_cast %7 : vector<32xf32> to vector<1x32xf32>
    %30 = vector.broadcast %29 : vector<1x32xf32> to vector<16x32xf32>
    %31 = arith.addf %28, %30 : vector<16x32xf32>
    %32 = arith.truncf %31 : vector<16x32xf32> to vector<16x32xbf16>
    %cst_13 = arith.constant dense<0.000000e+00> : vector<16xf32>
    %33 = vector.multi_reduction <add>, %3, %cst_13 [1] : vector<16x32xf32> to vector<16xf32>
    %34 = vector.shape_cast %33 : vector<16xf32> to vector<16x1xf32>
    %cst_14 = arith.constant 3.200000e+01 : f32
    %35 = vector.broadcast %cst_14 : f32 to vector<16x1xf32>
    %36 = arith.divf %34, %35 : vector<16x1xf32>
    %37 = vector.broadcast %36 : vector<16x1xf32> to vector<16x32xf32>
    %38 = arith.subf %3, %37 : vector<16x32xf32>
    %39 = arith.mulf %38, %38 : vector<16x32xf32>
    %cst_15 = arith.constant dense<0.000000e+00> : vector<16xf32>
    %40 = vector.multi_reduction <add>, %39, %cst_15 [1] : vector<16x32xf32> to vector<16xf32>
    %41 = vector.shape_cast %40 : vector<16xf32> to vector<16x1xf32>
    %cst_16 = arith.constant 3.200000e+01 : f32
    %42 = vector.broadcast %cst_16 : f32 to vector<16x1xf32>
    %43 = arith.divf %41, %42 : vector<16x1xf32>
    %44 = vector.broadcast %36 : vector<16x1xf32> to vector<16x32xf32>
    %45 = arith.subf %3, %44 : vector<16x32xf32>
    %cst_17 = arith.constant 9.99999974E-6 : f32
    %46 = vector.broadcast %cst_17 : f32 to vector<16x1xf32>
    %47 = arith.addf %43, %46 : vector<16x1xf32>
    %48 = math.rsqrt %47 : vector<16x1xf32>
    %49 = vector.broadcast %48 : vector<16x1xf32> to vector<16x32xf32>
    %50 = arith.mulf %45, %49 : vector<16x32xf32>
    %51 = vector.shape_cast %5 : vector<32xf32> to vector<1x32xf32>
    %52 = vector.broadcast %51 : vector<1x32xf32> to vector<16x32xf32>
    %53 = arith.mulf %50, %52 : vector<16x32xf32>
    %54 = vector.shape_cast %7 : vector<32xf32> to vector<1x32xf32>
    %55 = vector.broadcast %54 : vector<1x32xf32> to vector<16x32xf32>
    %56 = arith.addf %53, %55 : vector<16x32xf32>
    %57 = arith.truncf %56 : vector<16x32xf32> to vector<16x32xbf16>
    %c0_18 = arith.constant 0 : index
    %c0_19 = arith.constant 0 : index
    %58 = vector.load %arg5[%c0_18, %c0_19] : memref<32x64xbf16, #tpu.memory_space<vmem>>, vector<32x64xbf16>
    %cst_20 = arith.constant dense<0.000000e+00> : vector<16x64xf32>
    %59 = tpu.matmul %32, %58, %cst_20 {dimension_numbers = #tpu.dot_dimension_numbers<[1], [0], [0], [1], [0, 0, 1, 1], [], []>} : vector<16x32xbf16>, vector<32x64xbf16>, vector<16x64xf32> -> vector<16x64xf32>
    %c0_21 = arith.constant 0 : index
    %c0_22 = arith.constant 0 : index
    %60 = vector.load %arg6[%c0_21, %c0_22] : memref<1x64xf32, #tpu.memory_space<vmem>>, vector<1x64xf32>
    %61 = vector.shape_cast %60 : vector<1x64xf32> to vector<64xf32>
    %62 = vector.shape_cast %61 : vector<64xf32> to vector<1x64xf32>
    %63 = vector.broadcast %62 : vector<1x64xf32> to vector<16x64xf32>
    %64 = arith.addf %59, %63 : vector<16x64xf32>
    %c0_23 = arith.constant 0 : index
    %c0_24 = arith.constant 0 : index
    %65 = vector.load %arg7[%c0_23, %c0_24] : memref<32x64xbf16, #tpu.memory_space<vmem>>, vector<32x64xbf16>
    %cst_25 = arith.constant dense<0.000000e+00> : vector<16x64xf32>
    %66 = tpu.matmul %57, %65, %cst_25 {dimension_numbers = #tpu.dot_dimension_numbers<[1], [0], [0], [1], [0, 0, 1, 1], [], []>} : vector<16x32xbf16>, vector<32x64xbf16>, vector<16x64xf32> -> vector<16x64xf32>
    %c0_26 = arith.constant 0 : index
    %c0_27 = arith.constant 0 : index
    %67 = vector.load %arg8[%c0_26, %c0_27] : memref<1x64xf32, #tpu.memory_space<vmem>>, vector<1x64xf32>
    %68 = vector.shape_cast %67 : vector<1x64xf32> to vector<64xf32>
    %69 = vector.shape_cast %68 : vector<64xf32> to vector<1x64xf32>
    %70 = vector.broadcast %69 : vector<1x64xf32> to vector<16x64xf32>
    %71 = arith.addf %66, %70 : vector<16x64xf32>
    %72 = vector.extract_strided_slice %64 {offsets = [0, 0], sizes = [16, 32], strides = [1, 1]} : vector<16x64xf32> to vector<16x32xf32>
    %73 = vector.shape_cast %72 : vector<16x32xf32> to vector<2x8x32xf32>
    %74 = arith.truncf %73 : vector<2x8x32xf32> to vector<2x8x32xbf16>
    %75 = vector.extract_strided_slice %64 {offsets = [0, 32], sizes = [16, 32], strides = [1, 1]} : vector<16x64xf32> to vector<16x32xf32>
    %76 = vector.shape_cast %75 : vector<16x32xf32> to vector<2x8x32xf32>
    %77 = arith.truncf %76 : vector<2x8x32xf32> to vector<2x8x32xbf16>
    %78 = vector.extract_strided_slice %71 {offsets = [0, 0], sizes = [16, 32], strides = [1, 1]} : vector<16x64xf32> to vector<16x32xf32>
    %79 = vector.shape_cast %78 : vector<16x32xf32> to vector<2x8x32xf32>
    %80 = arith.truncf %79 : vector<2x8x32xf32> to vector<2x8x32xbf16>
    %81 = vector.extract_strided_slice %71 {offsets = [0, 32], sizes = [16, 32], strides = [1, 1]} : vector<16x64xf32> to vector<16x32xf32>
    %82 = vector.shape_cast %81 : vector<16x32xf32> to vector<2x8x32xf32>
    %83 = arith.truncf %82 : vector<2x8x32xf32> to vector<2x8x32xbf16>
    %84 = vector.extract_strided_slice %74 {offsets = [0, 0, 0], sizes = [2, 8, 8], strides = [1, 1, 1]} : vector<2x8x32xbf16> to vector<2x8x8xbf16>
    %85 = vector.extract_strided_slice %80 {offsets = [0, 0, 0], sizes = [2, 8, 8], strides = [1, 1, 1]} : vector<2x8x32xbf16> to vector<2x8x8xbf16>
    %86 = vector.extract_strided_slice %77 {offsets = [0, 0, 0], sizes = [2, 8, 8], strides = [1, 1, 1]} : vector<2x8x32xbf16> to vector<2x8x8xbf16>
    %87 = vector.extract_strided_slice %83 {offsets = [0, 0, 0], sizes = [2, 8, 8], strides = [1, 1, 1]} : vector<2x8x32xbf16> to vector<2x8x8xbf16>
    "tpu.trace_start"() <{level = 10 : i32, message = "bqd,bkd->bqk"}> : () -> ()
    %cst_28 = arith.constant dense<0.000000e+00> : vector<2x8x8xf32>
    %88 = tpu.matmul %84, %85, %cst_28 {dimension_numbers = #tpu.dot_dimension_numbers<[2], [2], [1], [1], [0, 0, 0, 1, 1, 1], [0], [0]>} : vector<2x8x8xbf16>, vector<2x8x8xbf16>, vector<2x8x8xf32> -> vector<2x8x8xf32>
    "tpu.trace_stop"() : () -> ()
    %cst_29 = arith.constant 1.000000e-01 : f32
    %89 = vector.broadcast %cst_29 : f32 to vector<2x8x8xf32>
    %90 = arith.mulf %88, %89 : vector<2x8x8xf32>
    %cst_30 = arith.constant dense<0xFF800000> : vector<2x8xf32>
    %91 = vector.multi_reduction <maximumf>, %90, %cst_30 [2] : vector<2x8x8xf32> to vector<2x8xf32>
    %92 = vector.shape_cast %91 : vector<2x8xf32> to vector<2x8x1xf32>
    %93 = vector.broadcast %92 : vector<2x8x1xf32> to vector<2x8x8xf32>
    %94 = arith.subf %90, %93 : vector<2x8x8xf32>
    %95 = math.exp %94 : vector<2x8x8xf32>
    %cst_31 = arith.constant dense<0.000000e+00> : vector<2x8xf32>
    %96 = vector.multi_reduction <add>, %95, %cst_31 [2] : vector<2x8x8xf32> to vector<2x8xf32>
    %97 = vector.shape_cast %96 : vector<2x8xf32> to vector<2x8x1xf32>
    %98 = tpu.reciprocal %97 {approx = true} : vector<2x8x1xf32> -> vector<2x8x1xf32>
    %99 = vector.broadcast %98 : vector<2x8x1xf32> to vector<2x8x8xf32>
    %100 = arith.mulf %95, %99 : vector<2x8x8xf32>
    %101 = arith.truncf %100 : vector<2x8x8xf32> to vector<2x8x8xbf16>
    %cst_32 = arith.constant dense<0xFF800000> : vector<2x8xf32>
    %102 = vector.multi_reduction <maximumf>, %90, %cst_32 [1] : vector<2x8x8xf32> to vector<2x8xf32>
    %103 = vector.shape_cast %102 : vector<2x8xf32> to vector<2x1x8xf32>
    %104 = vector.broadcast %103 : vector<2x1x8xf32> to vector<2x8x8xf32>
    %105 = arith.subf %90, %104 : vector<2x8x8xf32>
    %106 = math.exp %105 : vector<2x8x8xf32>
    %cst_33 = arith.constant dense<0.000000e+00> : vector<2x8xf32>
    %107 = vector.multi_reduction <add>, %106, %cst_33 [1] : vector<2x8x8xf32> to vector<2x8xf32>
    %108 = vector.shape_cast %107 : vector<2x8xf32> to vector<2x1x8xf32>
    %109 = tpu.reciprocal %108 {approx = true} : vector<2x1x8xf32> -> vector<2x1x8xf32>
    %110 = vector.broadcast %109 : vector<2x1x8xf32> to vector<2x8x8xf32>
    %111 = arith.mulf %106, %110 : vector<2x8x8xf32>
    %112 = arith.truncf %111 : vector<2x8x8xf32> to vector<2x8x8xbf16>
    "tpu.trace_start"() <{level = 10 : i32, message = "bqk,bkd->bqd"}> : () -> ()
    %cst_34 = arith.constant dense<0.000000e+00> : vector<2x8x8xf32>
    %113 = tpu.matmul %101, %87, %cst_34 {dimension_numbers = #tpu.dot_dimension_numbers<[2], [1], [1], [2], [0, 0, 0, 1, 1, 2], [0], [0]>} : vector<2x8x8xbf16>, vector<2x8x8xbf16>, vector<2x8x8xf32> -> vector<2x8x8xf32>
    "tpu.trace_stop"() : () -> ()
    "tpu.trace_start"() <{level = 10 : i32, message = "bqk,bqd->bkd"}> : () -> ()
    %cst_35 = arith.constant dense<0.000000e+00> : vector<2x8x8xf32>
    %114 = tpu.matmul %112, %86, %cst_35 {dimension_numbers = #tpu.dot_dimension_numbers<[1], [1], [2], [2], [0, 0, 0, 2, 1, 2], [0], [0]>} : vector<2x8x8xbf16>, vector<2x8x8xbf16>, vector<2x8x8xf32> -> vector<2x8x8xf32>
    "tpu.trace_stop"() : () -> ()
    %115 = vector.extract_strided_slice %74 {offsets = [0, 0, 8], sizes = [2, 8, 8], strides = [1, 1, 1]} : vector<2x8x32xbf16> to vector<2x8x8xbf16>
    %116 = vector.extract_strided_slice %80 {offsets = [0, 0, 8], sizes = [2, 8, 8], strides = [1, 1, 1]} : vector<2x8x32xbf16> to vector<2x8x8xbf16>
    %117 = vector.extract_strided_slice %77 {offsets = [0, 0, 8], sizes = [2, 8, 8], strides = [1, 1, 1]} : vector<2x8x32xbf16> to vector<2x8x8xbf16>
    %118 = vector.extract_strided_slice %83 {offsets = [0, 0, 8], sizes = [2, 8, 8], strides = [1, 1, 1]} : vector<2x8x32xbf16> to vector<2x8x8xbf16>
    "tpu.trace_start"() <{level = 10 : i32, message = "bqd,bkd->bqk"}> : () -> ()
    %cst_36 = arith.constant dense<0.000000e+00> : vector<2x8x8xf32>
    %119 = tpu.matmul %115, %116, %cst_36 {dimension_numbers = #tpu.dot_dimension_numbers<[2], [2], [1], [1], [0, 0, 0, 1, 1, 1], [0], [0]>} : vector<2x8x8xbf16>, vector<2x8x8xbf16>, vector<2x8x8xf32> -> vector<2x8x8xf32>
    "tpu.trace_stop"() : () -> ()
    %cst_37 = arith.constant 1.000000e-01 : f32
    %120 = vector.broadcast %cst_37 : f32 to vector<2x8x8xf32>
    %121 = arith.mulf %119, %120 : vector<2x8x8xf32>
    %cst_38 = arith.constant dense<0xFF800000> : vector<2x8xf32>
    %122 = vector.multi_reduction <maximumf>, %121, %cst_38 [2] : vector<2x8x8xf32> to vector<2x8xf32>
    %123 = vector.shape_cast %122 : vector<2x8xf32> to vector<2x8x1xf32>
    %124 = vector.broadcast %123 : vector<2x8x1xf32> to vector<2x8x8xf32>
    %125 = arith.subf %121, %124 : vector<2x8x8xf32>
    %126 = math.exp %125 : vector<2x8x8xf32>
    %cst_39 = arith.constant dense<0.000000e+00> : vector<2x8xf32>
    %127 = vector.multi_reduction <add>, %126, %cst_39 [2] : vector<2x8x8xf32> to vector<2x8xf32>
    %128 = vector.shape_cast %127 : vector<2x8xf32> to vector<2x8x1xf32>
    %129 = tpu.reciprocal %128 {approx = true} : vector<2x8x1xf32> -> vector<2x8x1xf32>
    %130 = vector.broadcast %129 : vector<2x8x1xf32> to vector<2x8x8xf32>
    %131 = arith.mulf %126, %130 : vector<2x8x8xf32>
    %132 = arith.truncf %131 : vector<2x8x8xf32> to vector<2x8x8xbf16>
    %cst_40 = arith.constant dense<0xFF800000> : vector<2x8xf32>
    %133 = vector.multi_reduction <maximumf>, %121, %cst_40 [1] : vector<2x8x8xf32> to vector<2x8xf32>
    %134 = vector.shape_cast %133 : vector<2x8xf32> to vector<2x1x8xf32>
    %135 = vector.broadcast %134 : vector<2x1x8xf32> to vector<2x8x8xf32>
    %136 = arith.subf %121, %135 : vector<2x8x8xf32>
    %137 = math.exp %136 : vector<2x8x8xf32>
    %cst_41 = arith.constant dense<0.000000e+00> : vector<2x8xf32>
    %138 = vector.multi_reduction <add>, %137, %cst_41 [1] : vector<2x8x8xf32> to vector<2x8xf32>
    %139 = vector.shape_cast %138 : vector<2x8xf32> to vector<2x1x8xf32>
    %140 = tpu.reciprocal %139 {approx = true} : vector<2x1x8xf32> -> vector<2x1x8xf32>
    %141 = vector.broadcast %140 : vector<2x1x8xf32> to vector<2x8x8xf32>
    %142 = arith.mulf %137, %141 : vector<2x8x8xf32>
    %143 = arith.truncf %142 : vector<2x8x8xf32> to vector<2x8x8xbf16>
    "tpu.trace_start"() <{level = 10 : i32, message = "bqk,bkd->bqd"}> : () -> ()
    %cst_42 = arith.constant dense<0.000000e+00> : vector<2x8x8xf32>
    %144 = tpu.matmul %132, %118, %cst_42 {dimension_numbers = #tpu.dot_dimension_numbers<[2], [1], [1], [2], [0, 0, 0, 1, 1, 2], [0], [0]>} : vector<2x8x8xbf16>, vector<2x8x8xbf16>, vector<2x8x8xf32> -> vector<2x8x8xf32>
    "tpu.trace_stop"() : () -> ()
    "tpu.trace_start"() <{level = 10 : i32, message = "bqk,bqd->bkd"}> : () -> ()
    %cst_43 = arith.constant dense<0.000000e+00> : vector<2x8x8xf32>
    %145 = tpu.matmul %143, %117, %cst_43 {dimension_numbers = #tpu.dot_dimension_numbers<[1], [1], [2], [2], [0, 0, 0, 2, 1, 2], [0], [0]>} : vector<2x8x8xbf16>, vector<2x8x8xbf16>, vector<2x8x8xf32> -> vector<2x8x8xf32>
    "tpu.trace_stop"() : () -> ()
    %146 = vector.extract_strided_slice %74 {offsets = [0, 0, 16], sizes = [2, 8, 8], strides = [1, 1, 1]} : vector<2x8x32xbf16> to vector<2x8x8xbf16>
    %147 = vector.extract_strided_slice %80 {offsets = [0, 0, 16], sizes = [2, 8, 8], strides = [1, 1, 1]} : vector<2x8x32xbf16> to vector<2x8x8xbf16>
    %148 = vector.extract_strided_slice %77 {offsets = [0, 0, 16], sizes = [2, 8, 8], strides = [1, 1, 1]} : vector<2x8x32xbf16> to vector<2x8x8xbf16>
    %149 = vector.extract_strided_slice %83 {offsets = [0, 0, 16], sizes = [2, 8, 8], strides = [1, 1, 1]} : vector<2x8x32xbf16> to vector<2x8x8xbf16>
    "tpu.trace_start"() <{level = 10 : i32, message = "bqd,bkd->bqk"}> : () -> ()
    %cst_44 = arith.constant dense<0.000000e+00> : vector<2x8x8xf32>
    %150 = tpu.matmul %146, %147, %cst_44 {dimension_numbers = #tpu.dot_dimension_numbers<[2], [2], [1], [1], [0, 0, 0, 1, 1, 1], [0], [0]>} : vector<2x8x8xbf16>, vector<2x8x8xbf16>, vector<2x8x8xf32> -> vector<2x8x8xf32>
    "tpu.trace_stop"() : () -> ()
    %cst_45 = arith.constant 1.000000e-01 : f32
    %151 = vector.broadcast %cst_45 : f32 to vector<2x8x8xf32>
    %152 = arith.mulf %150, %151 : vector<2x8x8xf32>
    %cst_46 = arith.constant dense<0xFF800000> : vector<2x8xf32>
    %153 = vector.multi_reduction <maximumf>, %152, %cst_46 [2] : vector<2x8x8xf32> to vector<2x8xf32>
    %154 = vector.shape_cast %153 : vector<2x8xf32> to vector<2x8x1xf32>
    %155 = vector.broadcast %154 : vector<2x8x1xf32> to vector<2x8x8xf32>
    %156 = arith.subf %152, %155 : vector<2x8x8xf32>
    %157 = math.exp %156 : vector<2x8x8xf32>
    %cst_47 = arith.constant dense<0.000000e+00> : vector<2x8xf32>
    %158 = vector.multi_reduction <add>, %157, %cst_47 [2] : vector<2x8x8xf32> to vector<2x8xf32>
    %159 = vector.shape_cast %158 : vector<2x8xf32> to vector<2x8x1xf32>
    %160 = tpu.reciprocal %159 {approx = true} : vector<2x8x1xf32> -> vector<2x8x1xf32>
    %161 = vector.broadcast %160 : vector<2x8x1xf32> to vector<2x8x8xf32>
    %162 = arith.mulf %157, %161 : vector<2x8x8xf32>
    %163 = arith.truncf %162 : vector<2x8x8xf32> to vector<2x8x8xbf16>
    %cst_48 = arith.constant dense<0xFF800000> : vector<2x8xf32>
    %164 = vector.multi_reduction <maximumf>, %152, %cst_48 [1] : vector<2x8x8xf32> to vector<2x8xf32>
    %165 = vector.shape_cast %164 : vector<2x8xf32> to vector<2x1x8xf32>
    %166 = vector.broadcast %165 : vector<2x1x8xf32> to vector<2x8x8xf32>
    %167 = arith.subf %152, %166 : vector<2x8x8xf32>
    %168 = math.exp %167 : vector<2x8x8xf32>
    %cst_49 = arith.constant dense<0.000000e+00> : vector<2x8xf32>
    %169 = vector.multi_reduction <add>, %168, %cst_49 [1] : vector<2x8x8xf32> to vector<2x8xf32>
    %170 = vector.shape_cast %169 : vector<2x8xf32> to vector<2x1x8xf32>
    %171 = tpu.reciprocal %170 {approx = true} : vector<2x1x8xf32> -> vector<2x1x8xf32>
    %172 = vector.broadcast %171 : vector<2x1x8xf32> to vector<2x8x8xf32>
    %173 = arith.mulf %168, %172 : vector<2x8x8xf32>
    %174 = arith.truncf %173 : vector<2x8x8xf32> to vector<2x8x8xbf16>
    "tpu.trace_start"() <{level = 10 : i32, message = "bqk,bkd->bqd"}> : () -> ()
    %cst_50 = arith.constant dense<0.000000e+00> : vector<2x8x8xf32>
    %175 = tpu.matmul %163, %149, %cst_50 {dimension_numbers = #tpu.dot_dimension_numbers<[2], [1], [1], [2], [0, 0, 0, 1, 1, 2], [0], [0]>} : vector<2x8x8xbf16>, vector<2x8x8xbf16>, vector<2x8x8xf32> -> vector<2x8x8xf32>
    "tpu.trace_stop"() : () -> ()
    "tpu.trace_start"() <{level = 10 : i32, message = "bqk,bqd->bkd"}> : () -> ()
    %cst_51 = arith.constant dense<0.000000e+00> : vector<2x8x8xf32>
    %176 = tpu.matmul %174, %148, %cst_51 {dimension_numbers = #tpu.dot_dimension_numbers<[1], [1], [2], [2], [0, 0, 0, 2, 1, 2], [0], [0]>} : vector<2x8x8xbf16>, vector<2x8x8xbf16>, vector<2x8x8xf32> -> vector<2x8x8xf32>
    "tpu.trace_stop"() : () -> ()
    %177 = vector.extract_strided_slice %74 {offsets = [0, 0, 24], sizes = [2, 8, 8], strides = [1, 1, 1]} : vector<2x8x32xbf16> to vector<2x8x8xbf16>
    %178 = vector.extract_strided_slice %80 {offsets = [0, 0, 24], sizes = [2, 8, 8], strides = [1, 1, 1]} : vector<2x8x32xbf16> to vector<2x8x8xbf16>
    %179 = vector.extract_strided_slice %77 {offsets = [0, 0, 24], sizes = [2, 8, 8], strides = [1, 1, 1]} : vector<2x8x32xbf16> to vector<2x8x8xbf16>
    %180 = vector.extract_strided_slice %83 {offsets = [0, 0, 24], sizes = [2, 8, 8], strides = [1, 1, 1]} : vector<2x8x32xbf16> to vector<2x8x8xbf16>
    "tpu.trace_start"() <{level = 10 : i32, message = "bqd,bkd->bqk"}> : () -> ()
    %cst_52 = arith.constant dense<0.000000e+00> : vector<2x8x8xf32>
    %181 = tpu.matmul %177, %178, %cst_52 {dimension_numbers = #tpu.dot_dimension_numbers<[2], [2], [1], [1], [0, 0, 0, 1, 1, 1], [0], [0]>} : vector<2x8x8xbf16>, vector<2x8x8xbf16>, vector<2x8x8xf32> -> vector<2x8x8xf32>
    "tpu.trace_stop"() : () -> ()
    %cst_53 = arith.constant 1.000000e-01 : f32
    %182 = vector.broadcast %cst_53 : f32 to vector<2x8x8xf32>
    %183 = arith.mulf %181, %182 : vector<2x8x8xf32>
    %cst_54 = arith.constant dense<0xFF800000> : vector<2x8xf32>
    %184 = vector.multi_reduction <maximumf>, %183, %cst_54 [2] : vector<2x8x8xf32> to vector<2x8xf32>
    %185 = vector.shape_cast %184 : vector<2x8xf32> to vector<2x8x1xf32>
    %186 = vector.broadcast %185 : vector<2x8x1xf32> to vector<2x8x8xf32>
    %187 = arith.subf %183, %186 : vector<2x8x8xf32>
    %188 = math.exp %187 : vector<2x8x8xf32>
    %cst_55 = arith.constant dense<0.000000e+00> : vector<2x8xf32>
    %189 = vector.multi_reduction <add>, %188, %cst_55 [2] : vector<2x8x8xf32> to vector<2x8xf32>
    %190 = vector.shape_cast %189 : vector<2x8xf32> to vector<2x8x1xf32>
    %191 = tpu.reciprocal %190 {approx = true} : vector<2x8x1xf32> -> vector<2x8x1xf32>
    %192 = vector.broadcast %191 : vector<2x8x1xf32> to vector<2x8x8xf32>
    %193 = arith.mulf %188, %192 : vector<2x8x8xf32>
    %194 = arith.truncf %193 : vector<2x8x8xf32> to vector<2x8x8xbf16>
    %cst_56 = arith.constant dense<0xFF800000> : vector<2x8xf32>
    %195 = vector.multi_reduction <maximumf>, %183, %cst_56 [1] : vector<2x8x8xf32> to vector<2x8xf32>
    %196 = vector.shape_cast %195 : vector<2x8xf32> to vector<2x1x8xf32>
    %197 = vector.broadcast %196 : vector<2x1x8xf32> to vector<2x8x8xf32>
    %198 = arith.subf %183, %197 : vector<2x8x8xf32>
    %199 = math.exp %198 : vector<2x8x8xf32>
    %cst_57 = arith.constant dense<0.000000e+00> : vector<2x8xf32>
    %200 = vector.multi_reduction <add>, %199, %cst_57 [1] : vector<2x8x8xf32> to vector<2x8xf32>
    %201 = vector.shape_cast %200 : vector<2x8xf32> to vector<2x1x8xf32>
    %202 = tpu.reciprocal %201 {approx = true} : vector<2x1x8xf32> -> vector<2x1x8xf32>
    %203 = vector.broadcast %202 : vector<2x1x8xf32> to vector<2x8x8xf32>
    %204 = arith.mulf %199, %203 : vector<2x8x8xf32>
    %205 = arith.truncf %204 : vector<2x8x8xf32> to vector<2x8x8xbf16>
    "tpu.trace_start"() <{level = 10 : i32, message = "bqk,bkd->bqd"}> : () -> ()
    %cst_58 = arith.constant dense<0.000000e+00> : vector<2x8x8xf32>
    %206 = tpu.matmul %194, %180, %cst_58 {dimension_numbers = #tpu.dot_dimension_numbers<[2], [1], [1], [2], [0, 0, 0, 1, 1, 2], [0], [0]>} : vector<2x8x8xbf16>, vector<2x8x8xbf16>, vector<2x8x8xf32> -> vector<2x8x8xf32>
    "tpu.trace_stop"() : () -> ()
    "tpu.trace_start"() <{level = 10 : i32, message = "bqk,bqd->bkd"}> : () -> ()
    %cst_59 = arith.constant dense<0.000000e+00> : vector<2x8x8xf32>
    %207 = tpu.matmul %205, %179, %cst_59 {dimension_numbers = #tpu.dot_dimension_numbers<[1], [1], [2], [2], [0, 0, 0, 2, 1, 2], [0], [0]>} : vector<2x8x8xbf16>, vector<2x8x8xbf16>, vector<2x8x8xf32> -> vector<2x8x8xf32>
    "tpu.trace_stop"() : () -> ()
    %208 = tpu.concatenate %113, %144, %175, %206 in 2 : vector<2x8x8xf32>, vector<2x8x8xf32>, vector<2x8x8xf32>, vector<2x8x8xf32> -> vector<2x8x32xf32>
    %209 = vector.shape_cast %208 : vector<2x8x32xf32> to vector<16x32xf32>
    %210 = tpu.concatenate %114, %145, %176, %207 in 2 : vector<2x8x8xf32>, vector<2x8x8xf32>, vector<2x8x8xf32>, vector<2x8x8xf32> -> vector<2x8x32xf32>
    %211 = vector.shape_cast %210 : vector<2x8x32xf32> to vector<16x32xf32>
    %212 = arith.truncf %209 : vector<16x32xf32> to vector<16x32xbf16>
    %c0_60 = arith.constant 0 : index
    %c0_61 = arith.constant 0 : index
    %213 = vector.load %arg9[%c0_60, %c0_61] : memref<32x32xbf16, #tpu.memory_space<vmem>>, vector<32x32xbf16>
    %cst_62 = arith.constant dense<0.000000e+00> : vector<16x32xf32>
    %214 = tpu.matmul %212, %213, %cst_62 {dimension_numbers = #tpu.dot_dimension_numbers<[1], [0], [0], [1], [0, 0, 1, 1], [], []>} : vector<16x32xbf16>, vector<32x32xbf16>, vector<16x32xf32> -> vector<16x32xf32>
    %c0_63 = arith.constant 0 : index
    %c0_64 = arith.constant 0 : index
    %215 = vector.load %arg10[%c0_63, %c0_64] : memref<1x32xf32, #tpu.memory_space<vmem>>, vector<1x32xf32>
    %216 = vector.shape_cast %215 : vector<1x32xf32> to vector<32xf32>
    %217 = vector.shape_cast %216 : vector<32xf32> to vector<1x32xf32>
    %218 = vector.broadcast %217 : vector<1x32xf32> to vector<16x32xf32>
    %219 = arith.addf %214, %218 : vector<16x32xf32>
    %220 = arith.truncf %211 : vector<16x32xf32> to vector<16x32xbf16>
    %c0_65 = arith.constant 0 : index
    %c0_66 = arith.constant 0 : index
    %221 = vector.load %arg11[%c0_65, %c0_66] : memref<32x32xbf16, #tpu.memory_space<vmem>>, vector<32x32xbf16>
    %cst_67 = arith.constant dense<0.000000e+00> : vector<16x32xf32>
    %222 = tpu.matmul %220, %221, %cst_67 {dimension_numbers = #tpu.dot_dimension_numbers<[1], [0], [0], [1], [0, 0, 1, 1], [], []>} : vector<16x32xbf16>, vector<32x32xbf16>, vector<16x32xf32> -> vector<16x32xf32>
    %c0_68 = arith.constant 0 : index
    %c0_69 = arith.constant 0 : index
    %223 = vector.load %arg12[%c0_68, %c0_69] : memref<1x32xf32, #tpu.memory_space<vmem>>, vector<1x32xf32>
    %224 = vector.shape_cast %223 : vector<1x32xf32> to vector<32xf32>
    %225 = vector.shape_cast %224 : vector<32xf32> to vector<1x32xf32>
    %226 = vector.broadcast %225 : vector<1x32xf32> to vector<16x32xf32>
    %227 = arith.addf %222, %226 : vector<16x32xf32>
    %228 = arith.addf %1, %219 : vector<16x32xf32>
    %229 = vector.shape_cast %228 : vector<16x32xf32> to vector<2x8x32xf32>
    %c0_70 = arith.constant 0 : index
    %c0_71 = arith.constant 0 : index
    %c0_72 = arith.constant 0 : index
    %230 = vector.load %arg13[%c0_70, %c0_71, %c0_72] : memref<2x8x32xf32, #tpu.memory_space<vmem>>, vector<2x8x32xf32>
    tpu.vector_store %arg13[%c0_70, %c0_71, %c0_72], %229 {strides = array<i32>} : memref<2x8x32xf32, #tpu.memory_space<vmem>>, vector<2x8x32xf32>,
    %231 = arith.addf %3, %227 : vector<16x32xf32>
    %232 = vector.shape_cast %231 : vector<16x32xf32> to vector<2x8x32xf32>
    %c0_73 = arith.constant 0 : index
    %c0_74 = arith.constant 0 : index
    %c0_75 = arith.constant 0 : index
    %233 = vector.load %arg14[%c0_73, %c0_74, %c0_75] : memref<2x8x32xf32, #tpu.memory_space<vmem>>, vector<2x8x32xf32>
    tpu.vector_store %arg14[%c0_73, %c0_74, %c0_75], %232 {strides = array<i32>} : memref<2x8x32xf32, #tpu.memory_space<vmem>>, vector<2x8x32xf32>,
    return
  }
  func.func @transform_0(%arg0: i32) -> (i32, i32, i32) {
    %c0_i32 = arith.constant 0 : i32
    %c0_i32_0 = arith.constant 0 : i32
    %c0_i32_1 = arith.constant 0 : i32
    return %arg0, %c0_i32, %c0_i32_0 : i32, i32, i32
  }
  func.func @transform_1(%arg0: i32) -> (i32, i32, i32) {
    %c0_i32 = arith.constant 0 : i32
    %c0_i32_0 = arith.constant 0 : i32
    %c0_i32_1 = arith.constant 0 : i32
    return %arg0, %c0_i32, %c0_i32_0 : i32, i32, i32
  }
  func.func @transform_2(%arg0: i32) -> (i32, i32) {
    %c0_i32 = arith.constant 0 : i32
    %c0_i32_0 = arith.constant 0 : i32
    %c0_i32_1 = arith.constant 0 : i32
    return %c0_i32, %c0_i32_0 : i32, i32
  }
  func.func @transform_3(%arg0: i32) -> (i32, i32) {
    %c0_i32 = arith.constant 0 : i32
    %c0_i32_0 = arith.constant 0 : i32
    %c0_i32_1 = arith.constant 0 : i32
    return %c0_i32, %c0_i32_0 : i32, i32
  }
  func.func @transform_4(%arg0: i32) -> (i32, i32) {
    %c0_i32 = arith.constant 0 : i32
    %c0_i32_0 = arith.constant 0 : i32
    %c0_i32_1 = arith.constant 0 : i32
    return %c0_i32, %c0_i32_0 : i32, i32
  }
  func.func @transform_5(%arg0: i32) -> (i32, i32) {
    %c0_i32 = arith.constant 0 : i32
    %c0_i32_0 = arith.constant 0 : i32
    %c0_i32_1 = arith.constant 0 : i32
    return %c0_i32, %c0_i32_0 : i32, i32
  }
  func.func @transform_6(%arg0: i32) -> (i32, i32) {
    %c0_i32 = arith.constant 0 : i32
    %c0_i32_0 = arith.constant 0 : i32
    %c0_i32_1 = arith.constant 0 : i32
    return %c0_i32, %c0_i32_0 : i32, i32
  }
  func.func @transform_7(%arg0: i32) -> (i32, i32) {
    %c0_i32 = arith.constant 0 : i32
    %c0_i32_0 = arith.constant 0 : i32
    %c0_i32_1 = arith.constant 0 : i32
    return %c0_i32, %c0_i32_0 : i32, i32
  }
  func.func @transform_8(%arg0: i32) -> (i32, i32) {
    %c0_i32 = arith.constant 0 : i32
    %c0_i32_0 = arith.constant 0 : i32
    %c0_i32_1 = arith.constant 0 : i32
    return %c0_i32, %c0_i32_0 : i32, i32
  }
  func.func @transform_9(%arg0: i32) -> (i32, i32) {
    %c0_i32 = arith.constant 0 : i32
    %c0_i32_0 = arith.constant 0 : i32
    %c0_i32_1 = arith.constant 0 : i32
    return %c0_i32, %c0_i32_0 : i32, i32
  }
  func.func @transform_10(%arg0: i32) -> (i32, i32) {
    %c0_i32 = arith.constant 0 : i32
    %c0_i32_0 = arith.constant 0 : i32
    %c0_i32_1 = arith.constant 0 : i32
    return %c0_i32, %c0_i32_0 : i32, i32
  }
  func.func @transform_11(%arg0: i32) -> (i32, i32) {
    %c0_i32 = arith.constant 0 : i32
    %c0_i32_0 = arith.constant 0 : i32
    %c0_i32_1 = arith.constant 0 : i32
    return %c0_i32, %c0_i32_0 : i32, i32
  }
  func.func @transform_12(%arg0: i32) -> (i32, i32, i32) {
    %c0_i32 = arith.constant 0 : i32
    %c0_i32_0 = arith.constant 0 : i32
    %c0_i32_1 = arith.constant 0 : i32
    return %arg0, %c0_i32, %c0_i32_0 : i32, i32, i32
  }
  func.func @transform_13(%arg0: i32) -> (i32, i32, i32) {
    %c0_i32 = arith.constant 0 : i32
    %c0_i32_0 = arith.constant 0 : i32
    %c0_i32_1 = arith.constant 0 : i32
    return %arg0, %c0_i32, %c0_i32_0 : i32, i32, i32
  }
}

</mosaic_0001>

<bundles_post_ra>
// kernel: tpu_custom_call.1
= control target key start
LH: loop header
LB: loop body
LE: loop exit
PB: predicated region body
PF: predicated region fallthrough
CT: control target
= control target key end

     0   :  { %s3317_s0 = inlined_call_operand.hbm [shape: f32[8,8,32], index: 0, kind: input, shape index: {}]   ;;  %s3318_s1 = inlined_call_operand.hbm [shape: f32[8,8,32], index: 1, kind: input, shape index: {}]   ;;  %s3319_s2 = inlined_call_operand.vmem [shape: f32[1,32], index: 2, kind: input, shape index: {}]   ;;  %s3320_s3 = inlined_call_operand.vmem [shape: f32[1,32], index: 3, kind: input, shape index: {}]   ;;  %s3321_s4 = inlined_call_operand.hbm [shape: bf16[32,64], index: 4, kind: input, shape index: {}]   ;;  %s3322_s5 = inlined_call_operand.vmem [shape: f32[1,64], index: 5, kind: input, shape index: {}]   ;;  %s3323_s6 = inlined_call_operand.hbm [shape: bf16[32,64], index: 6, kind: input, shape index: {}]   ;;  %s3324_s7 = inlined_call_operand.vmem [shape: f32[1,64], index: 7, kind: input, shape index: {}]   ;;  %s3325_s8 = inlined_call_operand.hbm [shape: bf16[32,32], index: 8, kind: input, shape index: {}]   ;;  %s3326_s9 = inlined_call_operand.vmem [shape: f32[1,32], index: 9, kind: input, shape index: {}]   ;;  %s3327_s10 = inlined_call_operand.hbm [shape: bf16[32,32], index: 10, kind: input, shape index: {}]   ;;  %s3328_s11 = inlined_call_operand.vmem [shape: f32[1,32], index: 11, kind: input, shape index: {}]   ;;  %s3329_s12 = inlined_call_operand.hbm [shape: f32[8,8,32], index: 12, kind: output, shape index: {0}]   ;;  %s3330_s13 = inlined_call_operand.hbm [shape: f32[8,8,32], index: 13, kind: output, shape index: {1}]  }
   0x1   :  { %3340 = sst [smem:[#allocation29_spill]] %s3317_s0 }
   0x2   :  { %3341 = sst [smem:[#allocation30_spill]] %s3321_s4 }
   0x3   :  { %3342 = sst [smem:[#allocation31_spill]] %s3323_s6 }
   0x4   :  { %3343 = sst [smem:[#allocation32_spill]] %s3325_s8 }
   0x5   :  { %3344 = sst [smem:[#allocation33_spill]] %s3327_s10 }
   0x6   :  { %3345 = sst [smem:[#allocation34_spill]] %s3330_s13 }
   0x7   :  { %19 = vsyncpa [#allocation3], 0 }
   0x8   :  { %21 = vsyncpa [#allocation3 + $0x1], 0 }
   0x9   :  { %22 = vsyncpa [#allocation6], 0 }
   0xa   :  { %24 = vsyncpa [#allocation6 + $0x1], 0 }
   0xb   :  { %25 = vsyncpa [#allocation9], 0 }
   0xc   :  { %26 = vsyncpa [#allocation12], 0 }
   0xd   :  { %27 = vsyncpa [#allocation4], 0 }
   0xe   :  { %29 = vsyncpa [#allocation4 + $0x1], 0 }
   0xf   :  { %30 = vsyncpa [#allocation15], 0 }
  0x10   :  { %32 = vsyncpa [#allocation15 + $0x1], 0  ;;  %s2770_s25 = smov 0   ;;  %s2772_s26 = smov 0  }
  0x11   :  { %s2774_s27 = smov 0   ;;  %s2776_s28 = smov 0  }
  0x12 LB: > { %3346 = sst [smem:[#allocation23_spill]] %s2666_s25  ;;  %s2791_s29 = sadd.s32 4294967295, %s2678_s28   ;;  %s2678_s28 = sphi %s2776_s28, %s3368_s28   ;;  %s2674_s27 = sphi %s2774_s27, %s3370_s27   ;;  %s2670_s26 = sphi %s2772_s26, %s3372_s26   ;;  %s2666_s25 = sphi %s2770_s25, %s3371_s25  }
  0x13   : > { %3347 = sst [smem:[#allocation24_spill]] %s2674_s27  ;;  %s2042_s30 = sadd.s32 4294967294, %s2678_s28  }
  0x14   : > { %p58_p0 = scmp.ne.s32.totalorder %s2670_s26, %s2666_s25  ;;  %p59_p1 = scmp.eq.s32.totalorder %s2791_s29, 0 }
  0x15   : > { %p318_p2 = scmp.eq.s32.totalorder %s2791_s29, 3  ;;  %p324_p3 = scmp.eq.s32.totalorder %s2042_s30, 3 }
  0x16   : > { %p2800_p4 = por %p59_p1, %p58_p0  ;;  %p2043_p5 = scmp.ge.s32.totalorder %s2678_s28, 1 }
  0x17   : > { %p2805_p6 = por %p324_p3, %p58_p0  ;;  %p357_p7 = scmp.lt.s32.totalorder %s2678_s28, 5 }
  0x18   : > { %s3351_s4 = sld [smem:[#allocation30_spill]]  ;;  %s2680_s20 = smov [#allocation7]  }
  0x19   : > { %s3349_s15 = scalar_select %p2805_p6, 1, 0 }
  0x1a   : > { %p2813_p8 = pnand %p2043_p5, %p357_p7  ;;  %s376_s21 = sshll.u32 %s2680_s20, 4  ;;  %s377_s21 = int_to_ptr.vmem [resolvable:$true] %s376_s21 }
  0x1b   : > { %3350 = sst [smem:[#allocation25_spill]] %s3349_s15  ;;  %s2681_s16 = smov 64  }
  0x1c   : > { %p2168_p9 = pneg %p2813_p8  ;;  %s3354_s6 = sld [smem:[#allocation31_spill]] }
  0x1d   : > { %s2682_s17 = smov 4   ;;  %s2683_s20 = smov [#allocation8]  }
  0x1e   : > { %s374_s18 = sshll.u32 %s3351_s4, 4  ;;  %p2821_p10 = pnand %p2168_p9, %p59_p1  ;;  %s375_s18 = int_to_ptr.hbm [resolvable:$true] %s374_s18 }
  0x1f   : > { %s393_s4 = sshll.u32 %s2683_s20, 4  ;;  %s3355_s8 = sld [smem:[#allocation32_spill]]  ;;  %s394_s4 = int_to_ptr.vmem [resolvable:$true] %s393_s4 }
  0x20   : > { %2171 = dma.hbm_to_vmem [thread:$0]  (!%p2821_p10), %s375_s18, 256, %s377_s21, [#allocation6], %s2681_s16, %s2681_s16, %s2682_s17  }
  0x21   : > { %s3356_s10 = sld [smem:[#allocation33_spill]]  ;;  %s2684_s21 = smov [#allocation10]  }
  0x22   : > { %s391_s30 = sshll.u32 %s3354_s6, 4  ;;  %s410_s20 = sshll.u32 %s2684_s21, 4  ;;  %s392_s30 = int_to_ptr.hbm [resolvable:$true] %s391_s30  ;;  %s411_s20 = int_to_ptr.vmem [resolvable:$true] %s410_s20 }
  0x23   : > { %2174 = dma.hbm_to_vmem [thread:$0]  (!%p2821_p10), %s392_s30, 256, %s394_s4, [#allocation9], %s2681_s16, %s2681_s16, %s2682_s17  }
  0x24   : > { %s2685_s25 = smov [#allocation11]   ;;  %s2843_s4 = sadd.s32 1, %s2678_s28  }
  0x25   : > { %s408_s13 = sshll.u32 %s3355_s8, 4  ;;  %s427_s15 = sshll.u32 %s2685_s25, 4  ;;  %s409_s13 = int_to_ptr.hbm [resolvable:$true] %s408_s13  ;;  %s428_s15 = int_to_ptr.vmem [resolvable:$true] %s427_s15 }
  0x26   : > { %2177 = dma.hbm_to_vmem [thread:$0]  (!%p2821_p10), %s409_s13, 256, %s411_s20, [#allocation9], %s2681_s16, %s2681_s16, %s2682_s17  }
  0x27   : > { %s425_s18 = sshll.u32 %s3356_s10, 4  ;;  %3357 = sst [smem:[#allocation26_spill]] %s2843_s4  ;;  %s426_s18 = int_to_ptr.hbm [resolvable:$true] %s425_s18 }
  0x28   : > { %2180 = dma.hbm_to_vmem [thread:$0]  (!%p2821_p10), %s426_s18, 256, %s428_s15, [#allocation12], %s2681_s16, %s2681_s16, %s2682_s17  }
  0x29   : > { %s45_s30 = sadd.s32 1, %s2674_s27  ;;  %s42_s23 = ssub.s32 %s2678_s28, %s2843_s4 }
  0x2a   : > { %p52_p11 = scmp.ne.s32.totalorder %s2674_s27, %s2670_s26  ;;  %p43_p12 = scmp.eq.s32.totalorder %s42_s23, 0 }
  0x2b   : > { %p53_p13 = scmp.eq.s32.totalorder %s2678_s28, 0  ;;  %p2199_p3 = scmp.lt.s32.totalorder %s2678_s28, 4 }
  0x2c   : > { %p2853_p0 = por %p318_p2, %p52_p11  ;;  %s444_s21 = sand.u32 1, %s2674_s27  }
  0x2d   : > { %s2859_s13 = scalar_select %p43_p12, %s2674_s27, %s45_s30  }
  0x2e   : > { %s3358_s24 = scalar_select %p2853_p0, 1, 0 }
  0x2f   : > { %3360 = sst [smem:[#allocation28_spill]] %s2859_s13  ;;  %p54_p5 = por %p53_p13, %p52_p11 }
  0x30   : > { %3359 = sst [smem:[#allocation27_spill]] %s3358_s24  ;;  %s2862_s22 = sshll.u32 %s444_s21, 4 }
  0x31   : > { %s3334_s16 = sshll.u32 %s2678_s28, 4  ;;  %s3361_s0 = sld [smem:[#allocation29_spill]] }
  0x32   : > { %s448_s25 = scalar_lea.vmem [#allocation2], %s2862_s22  ;;  %p2871_p2 = pnand %p2199_p3, %p54_p5 }
  0x33   : > { %s456_s15 = sshll.u32 %s448_s25, 4  ;;  %s445_s30 = scalar_lea.sflag [#allocation3], %s444_s21  ;;  %s457_s15 = int_to_ptr.vmem [resolvable:$true] %s456_s15 }
  0x34   : > { %p2508_p9 = pneg %p2871_p2 }
  0x37   : > { %s453_s20 = scalar_lea.hbm %s3361_s0, %s3334_s16 }
  0x38   : > { %s454_s23 = sshll.u32 %s453_s20, 4  ;;  %s2511_s20 = scalar_lea.hbm %s3361_s0, 64  ;;  %s455_s23 = int_to_ptr.hbm [resolvable:$true] %s454_s23 }
  0x39   : > { %s2504_s8 = sshra.s32 %s455_s23, 4  ;;  %s2505_s8 = int_to_ptr.hbm [resolvable:$true] %s2504_s8 }
  0x3a   : > { %s2506_s10 = scalar_lea.hbm %s2505_s8, 16  ;;  %p2512_p12 = scmp.lt.s32.totalorder %s2505_s8, %s3361_s0 }
  0x3b   : > { %p2507_p7 = scmp.ne.s32.totalorder %s2505_s8, %s2506_s10  ;;  %p2513_p13 = scmp.lt.s32.totalorder %s2511_s20, %s2506_s10 }
  0x3d   : > { %p2509_p10 = pnand %p2508_p9, %p2507_p7  ;;  %p2514_p3 = por %p2513_p13, %p2512_p12 }
  0x3f   : > { %p2510_p11 = pneg %p2509_p10 }
  0x41   : > { %p2515_p5 = pnand %p2514_p3, %p2510_p11 }
  0x43   : > { %2518 = shalt.err (!%p2515_p5)
}
  0x44   : > { %s2686_s21 = smov 128   ;;  %s2687_s13 = smov 8  }
  0x45   : > { %2184 = dma.hbm_to_vmem [thread:$0]  (!%p2871_p2), %s455_s23, 256, %s457_s15, %s445_s30, %s2686_s21, %s2686_s21, %s2687_s13  }
  0x46   : > { %s3363_s27 = sshll.u32 %s2678_s28, 4  ;;  %s470_s16 = scalar_lea.vmem [#allocation5], %s2862_s22 }
  0x47   : > { %s475_s4 = scalar_lea.hbm %s3318_s1, %s3363_s27  ;;  %s478_s8 = sshll.u32 %s470_s16, 4  ;;  %s479_s8 = int_to_ptr.vmem [resolvable:$true] %s478_s8 }
  0x48   : > { %s476_s10 = sshll.u32 %s475_s4, 4  ;;  %s466_s20 = sand.u32 1, %s2678_s28   ;;  %s477_s10 = int_to_ptr.hbm [resolvable:$true] %s476_s10 }
  0x49   : > { %s467_s25 = scalar_lea.sflag [#allocation6], %s466_s20  ;;  %s2534_s0 = sshra.s32 %s477_s10, 4  ;;  %s2535_s0 = int_to_ptr.hbm [resolvable:$true] %s2534_s0 }
  0x4a   : > { %s2536_s24 = scalar_lea.hbm %s2535_s0, 16  ;;  %s2541_s30 = scalar_lea.hbm %s3318_s1, 64 }
  0x4b   : > { %p2537_p7 = scmp.ne.s32.totalorder %s2535_s0, %s2536_s24  ;;  %p2542_p12 = scmp.lt.s32.totalorder %s2535_s0, %s3318_s1 }
  0x4c   : > { %p2543_p13 = scmp.lt.s32.totalorder %s2541_s30, %s2536_s24 }
  0x4d   : > { %p2539_p10 = pnand %p2537_p7, %p2508_p9 }
  0x4e   : > { %p2544_p3 = por %p2543_p13, %p2542_p12 }
  0x4f   : > { %p2540_p11 = pneg %p2539_p10 }
  0x51   : > { %p2545_p5 = pnand %p2544_p3, %p2540_p11 }
  0x53   : > { %2548 = shalt.err (!%p2545_p5)
}
  0x54   : > { %2187 = dma.hbm_to_vmem [thread:$0]  (!%p2871_p2), %s477_s10, 256, %s479_s8, %s467_s25, %s2686_s21, %s2686_s21, %s2687_s13  }
  0x55   : > { %490 = sbr.rel (%p2813_p8) target bundleno = 2753 (0xac1), region = 68  ;;  %s2909_s4 = sand.u32 (!%p2813_p8), 1, %s2670_s26  }
  0x56   : > { %s2912_s17 = sshll.u32 (!%p2813_p8), %s2909_s4, 4  ;;  %s493_s0 = scalar_lea.sflag (!%p2813_p8), [#allocation3], %s2909_s4 }
  0x57   : > { %s2916_s24 = scalar_lea.vmem (!%p2813_p8), [#allocation2], %s2912_s17 }
  0x5a   : > { %2637 = dma.done.wait (%p2800_p4), %s493_s0, 256  }
  0x5b   : > { %2639 = vsyncadd (%p2800_p4), %s493_s0, 4294967040  ;;  %s502_s6 = sand.u32 1, %s2791_s29   ;;  %s2924_s13 = scalar_lea.vmem [#allocation5], %s2912_s17 }
  0x5c   : > { %s503_s19 = scalar_lea.sflag [#allocation6], %s502_s6 }
  0x5d   : > { %2641 = dma.done.wait (%p2800_p4), %s503_s19, 256  }
  0x5e   : > { %2643 = vsyncadd (%p2800_p4), %s503_s19, 4294967040 }
  0x5f   : > { %2645 = dma.done.wait (%p59_p1), [#allocation6], 256  }
  0x60   : > { %2647 = vsyncadd (%p59_p1), [#allocation6], 4294967040 }
  0x61   : > { %2649 = dma.done.wait (%p59_p1), [#allocation9], 512  }
  0x62   : > { %2651 = vsyncadd (%p59_p1), [#allocation9], 4294966784 }
  0x63   : > { %2653 = dma.done.wait (%p59_p1), [#allocation12], 256  }
  0x64   : > { %2655 = vsyncadd (%p59_p1), [#allocation12], 4294967040  ;;  %vm591_vm0 = vcmask 261120   ;;  %v587_v0 = vld [vmem:[%s2924_s13] sm:$0xff]  ;;  %v588_v4 = vld [vmem:[%s2924_s13 + $0x8] sm:$0xff]  ;;  %v2688_v8 = vmov 32.0  }
  0x65   : > { %v585_v1 = vld [vmem:[%s2916_s24] sm:$0xff]  ;;  %v654_v2 = vsel %vm591_vm0, %v587_v0, 0.0  ;;  %v586_v5 = vld [vmem:[%s2916_s24 + $0x8] sm:$0xff]  ;;  %v657_v6 = vsel %vm591_vm0, %v588_v4, 0.0  ;;  %2306 = vrcp.f32 %v2688_v8  ;;  %vm781_vm14 = vcmask 64512   ;;  %s2689_s15 = smov 96  }
  0x66   : > { %v592_v3 = vsel %vm591_vm0, %v585_v1, 0.0  ;;  %655 = vadd.xlane.f32.xlu0 %v654_v2  ;;  %v595_v7 = vsel %vm591_vm0, %v586_v5, 0.0  ;;  %v2135_v35 = vld [vmem:[#allocation7 + $0x8] sm:$0xff]  ;;  %v2137_v36 = vld [vmem:[#allocation8 + $0x8] sm:$0xff]  ;;  %v2134_v41 = vld [vmem:[#allocation7] sm:$0xff]  ;;  %vm892_vm15 = vcmask 1043456  }
  0x67   : > { %593 = vadd.xlane.f32.xlu1 %v592_v3  ;;  %732 = vmatpush.bf16.msra.mxu0 %v2135_v35  ;;  %v2136_v42 = vld [vmem:[#allocation8] sm:$0xff]  ;;  %v2302_v35 = vld [vmem:[%s3322_s5] ss:$0 sm:$0xff]  ;;  %s2690_s23 = smov 120   ;;  %s2691_s30 = smov 88  }
  0x68   : > { %769 = vmatpush.bf16.msra.mxu1 %v2137_v36  ;;  %s2692_s27 = smov 112   ;;  %s2693_s22 = smov 80  }
  0x69   : > { %s2694_s0 = smov 104   ;;  %s2695_s6 = smov 72  }
  0x6a   : > { %s2696_s19 = smov 8   ;;  %s2697_s14 = smov 16  }
  0x6b   : > { %v2307_v9 = vpop.eup %2306  ;;  %733 = vmatpush.bf16.msra.mxu0 %v2134_v41  ;;  %s2698_s21 = smov 24   ;;  %s2142_s8 = sshll.u32 %s2791_s29, 4 }
  0x6c   : > { %v599_v10 = vmul.f32 32.0, %v2307_v9  ;;  %vm603_vm1 = vweird.f32 %v2307_v9  ;;  %770 = vmatpush.bf16.msra.mxu1 %v2136_v42  ;;  %s572_s10 = scalar_lea.vmem [#allocation13], %s2912_s17  ;;  %s579_s18 = scalar_lea.vmem [#allocation14], %s2912_s17 }
  0x6d   : > { %s1838_s16 = scalar_lea.sflag [#allocation4], %s2909_s4 }
  0x6e   : > { %658 = vadd.xlane.f32.xlu0 %v657_v6  ;;  %v600_v11 = vsub.f32 1.0, %v599_v10 }
  0x6f   : > { %596 = vadd.xlane.f32.xlu1 %v595_v7 }
  0x70   : > { %v601_v12 = vmul.f32 %v2307_v9, %v600_v11 }
  0x72   : > { %v602_v13 = vadd.f32 %v2307_v9, %v601_v12  ;;  %v2300_v12 = vld [vmem:[%s3319_s2] ss:$0 sm:$0xff] }
  0x74   : > { %v604_v14 = vsel %vm603_vm1, %v2307_v9, %v602_v13  ;;  %vm1717_vm1 = vcmask 130048  }
  0xd9   : > { %v656_v15 = vpop.xlane.xlu0 %655 }
  0xda   : > { %v594_v16 = vpop.xlane.xlu1 %593  ;;  %v660_v17 = vmul.f32 %v656_v15, %v604_v14 }
  0xdb   : > { %v605_v18 = vmul.f32 %v604_v14, %v594_v16 }
  0xdc   : > { %v2950_v19 = vsub.f32 %v587_v0, %v660_v17 }
  0xdd   : > { %v2952_v20 = vsub.f32 %v585_v1, %v605_v18 }
  0xde   : > { %v664_v21 = vmul.f32 %v2950_v19, %v2950_v19 }
  0xdf   : > { %v609_v22 = vmul.f32 %v2952_v20, %v2952_v20 }
  0xe0   : > { %v666_v23 = vsel %vm591_vm0, %v664_v21, 0.0 }
  0xe1   : > { %v611_v24 = vsel %vm591_vm0, %v609_v22, 0.0  ;;  %667 = vadd.xlane.f32.xlu2 %v666_v23  ;;  %v659_v25 = vpop.xlane.xlu0 %658 }
  0xe2   : > { %612 = vadd.xlane.f32.xlu0 %v611_v24  ;;  %v597_v26 = vpop.xlane.xlu1 %596  ;;  %v661_v27 = vmul.f32 %v659_v25, %v604_v14 }
  0xe3   : > { %v606_v28 = vmul.f32 %v604_v14, %v597_v26 }
  0xe4   : > { %v2960_v29 = vsub.f32 %v588_v4, %v661_v27 }
  0xe5   : > { %v2962_v30 = vsub.f32 %v586_v5, %v606_v28 }
  0xe6   : > { %v665_v31 = vmul.f32 %v2960_v29, %v2960_v29 }
  0xe7   : > { %v610_v32 = vmul.f32 %v2962_v30, %v2962_v30 }
  0xe8   : > { %v669_v33 = vsel %vm591_vm0, %v665_v31, 0.0 }
  0xe9   : > { %v614_v34 = vsel %vm591_vm0, %v610_v32, 0.0  ;;  %670 = vadd.xlane.f32.xlu2 %v669_v33 }
  0xea   : > { %615 = vadd.xlane.f32.xlu1 %v614_v34 }
 0x154   : > { %v668_v37 = vpop.xlane.xlu2 %667 }
 0x155   : > { %v613_v38 = vpop.xlane.xlu0 %612  ;;  %v672_v39 = vmul.f32 %v668_v37, %v604_v14 }
 0x156   : > { %v617_v40 = vmul.f32 %v613_v38, %v604_v14 }
 0x157   : > { %v674_v43 = vadd.f32 1e-05, %v672_v39 }
 0x158   : > { %v619_v44 = vadd.f32 1e-05, %v617_v40 }
 0x159   : > { %2308 = vrsqrt.f32 %v674_v43  ;;  %vm682_vm5 = vweird.f32 %v674_v43 }
 0x15a   : > { %2310 = vrsqrt.f32 %v619_v44  ;;  %vm627_vm3 = vweird.f32 %v619_v44 }
 0x15c   : > { %v671_v45 = vpop.xlane.xlu2 %670 }
 0x15d   : > { %v616_v46 = vpop.xlane.xlu1 %615  ;;  %v673_v47 = vmul.f32 %v671_v45, %v604_v14 }
 0x15e   : > { %v618_v48 = vmul.f32 %v616_v46, %v604_v14 }
 0x15f   : > { %v2309_v49 = vpop.eup %2308  ;;  %v675_v50 = vadd.f32 1e-05, %v673_v47 }
 0x160   : > { %v620_v51 = vadd.f32 1e-05, %v618_v48  ;;  %v2311_v52 = vpop.eup %2310  ;;  %v677_v53 = vmul.f32 %v2309_v49, %v674_v43  ;;  %vm683_vm2 = vweird.f32 %v2309_v49 }
 0x161   : > { %v622_v54 = vmul.f32 %v2311_v52, %v619_v44  ;;  %2312 = vrsqrt.f32 %v675_v50  ;;  %vm628_vm4 = vweird.f32 %v2311_v52  ;;  %vm684_vm6 = vmor %vm682_vm5, %vm683_vm2  ;;  %vm692_vm11 = vweird.f32 %v675_v50 }
 0x162   : > { %v678_v55 = vmul.f32 %v2309_v49, %v677_v53  ;;  %2314 = vrsqrt.f32 %v620_v51  ;;  %vm629_vm7 = vmor %vm627_vm3, %vm628_vm4  ;;  %vm637_vm9 = vweird.f32 %v620_v51  ;;  %vm1720_vm2 = vcmask 195584  }
 0x163   : > { %v623_v56 = vmul.f32 %v2311_v52, %v622_v54 }
 0x164   : > { %v679_v57 = vmul.f32 0.5, %v678_v55 }
 0x165   : > { %v624_v58 = vmul.f32 0.5, %v623_v56 }
 0x166   : > { %v680_v59 = vsub.f32 1.5, %v679_v57 }
 0x167   : > { %v2313_v60 = vpop.eup %2312  ;;  %v625_v61 = vsub.f32 1.5, %v624_v58 }
 0x168   : > { %v2315_v62 = vpop.eup %2314  ;;  %v681_v63 = vmul.f32 %v2309_v49, %v680_v59  ;;  %v687_v0 = vmul.f32 %v2313_v60, %v675_v50  ;;  %vm693_vm8 = vweird.f32 %v2313_v60 }
 0x169   : > { %v626_v1 = vmul.f32 %v2311_v52, %v625_v61  ;;  %v632_v2 = vmul.f32 %v2315_v62, %v620_v51  ;;  %vm638_vm10 = vweird.f32 %v2315_v62  ;;  %vm694_vm12 = vmor %vm692_vm11, %vm693_vm8 }
 0x16a   : > { %v688_v3 = vmul.f32 %v2313_v60, %v687_v0  ;;  %v685_v5 = vsel %vm684_vm6, %v2309_v49, %v681_v63  ;;  %vm639_vm13 = vmor %vm637_vm9, %vm638_vm10 }
 0x16b   : > { %v633_v4 = vmul.f32 %v2315_v62, %v632_v2  ;;  %v630_v7 = vsel %vm629_vm7, %v2311_v52, %v626_v1  ;;  %v696_v10 = vmul.f32 %v685_v5, %v2950_v19  ;;  %v2301_v19 = vld [vmem:[%s3320_s3] ss:$0 sm:$0xff] }
 0x16c   : > { %v689_v6 = vmul.f32 0.5, %v688_v3  ;;  %v641_v13 = vmul.f32 %v630_v7, %v2952_v20 }
 0x16d   : > { %v634_v8 = vmul.f32 0.5, %v633_v4  ;;  %v698_v21 = vmul.f32 %v2300_v12, %v696_v10 }
 0x16e   : > { %v690_v9 = vsub.f32 1.5, %v689_v6  ;;  %v646_v23 = vmul.f32 %v2300_v12, %v641_v13 }
 0x16f   : > { %v635_v11 = vsub.f32 1.5, %v634_v8  ;;  %v700_v20 = vadd.f32 %v2301_v19, %v698_v21 }
 0x170   : > { %v691_v14 = vmul.f32 %v2313_v60, %v690_v9  ;;  %v651_v27 = vadd.f32 %v2301_v19, %v646_v23 }
 0x171   : > { %v636_v15 = vmul.f32 %v2315_v62, %v635_v11 }
 0x172   : > { %v695_v16 = vsel %vm694_vm12, %v2313_v60, %v691_v14 }
 0x173   : > { %v697_v17 = vmul.f32 %v695_v16, %v2960_v29  ;;  %v640_v18 = vsel %vm639_vm13, %v2315_v62, %v636_v15  ;;  %v2303_v29 = vld [vmem:[%s3324_s7] ss:$0 sm:$0xff] }
 0x174   : > { %v642_v22 = vmul.f32 %v640_v18, %v2962_v30 }
 0x175   : > { %v699_v24 = vmul.f32 %v2300_v12, %v697_v17 }
 0x176   : > { %v647_v25 = vmul.f32 %v2300_v12, %v642_v22 }
 0x177   : > { %v701_v26 = vadd.f32 %v2301_v19, %v699_v24 }
 0x178   : > { %v652_v28 = vadd.f32 %v2301_v19, %v647_v25 }
 0x179   : > { %v702_v31 = vpack.c.bf16 %v701_v26, %v700_v20 }
 0x17a   : > { %v653_v32 = vpack.c.bf16 %v652_v28, %v651_v27 }
 0x17b   : > { %2081 = vmatmul.msk.bf16.vlgmr.msra.gmra.mxu1 %vm591_vm0, %v702_v31 }
 0x17c   : > { %2072 = vmatmul.msk.bf16.vlgmr.msra.gmra.mxu0 %vm591_vm0, %v653_v32 }
 0x1f8   : > { %v772_v33 = vpop.f32.mrf.mxu1 }
 0x1f9   : > { %v773_v34 = vadd.f32 %v2303_v29, %v772_v33  ;;  %v735_v30 = vpop.f32.mrf.mxu0 }
 0x1fa   : > { %v736_v38 = vadd.f32 %v2302_v35, %v735_v30 }
 0x1fb   : > { %v779_v36 = vpack.c.bf16 %v773_v34, %v773_v34 }
 0x1fc   : > { %v777_v41 = vpack.c.bf16 %v736_v38, %v736_v38 }
 0x1fd   : > { %v786_v37 = vsel %vm781_vm14, %v779_v36, 0  ;;  %v885_v59 = vunpack.c.l.b16 %v779_v36 }
 0x1fe   : > { %795 = vmatpush.bf16.xpose.msra.mxu2 %v786_v37  ;;  %v950_v15 = vunpack.c.l.b16 %v777_v41 }
 0x1ff   : > { %v3011_v60 = vpack.c.b16 %v885_v59, %v885_v59 }
 0x200   : > { %v774_v39 = vpop.f32.mrf.mxu1  ;;  %v3030_v16 = vpack.c.b16 %v950_v15, %v950_v15 }
 0x201   : > { %v775_v40 = vadd.f32 %v2303_v29, %v774_v39  ;;  %v737_v43 = vpop.f32.mrf.mxu0 }
 0x202   : > { %v738_v46 = vadd.f32 %v2302_v35, %v737_v43 }
 0x203   : > { %v780_v42 = vpack.c.bf16 %v775_v40, %v775_v40 }
 0x204   : > { %v778_v48 = vpack.c.bf16 %v738_v46, %v738_v46 }
 0x205   : > { %v910_v44 = vunpack.c.l.b16 %v780_v42  ;;  %2082 = vmatmul.msk.bf16.vlgmr.msra.gmra.mxu2 %vm781_vm14, %v777_v41  ;;  %v805_v45 = vsel %vm781_vm14, %v780_v42, 0 }
 0x206   : > { %814 = vmatpush.bf16.xpose.msra.mxu3 %v805_v45  ;;  %v990_v11 = vunpack.c.l.b16 %v778_v48 }
 0x207   : > { %v2991_v47 = vpack.c.b16 %v910_v44, %v910_v44 }
 0x208   : > { %v3025_v13 = vpack.c.b16 %v990_v11, %v990_v11 }
 0x209   : > { %912 = vrot.lane.b32.xlu1 %v2991_v47, %s2689_s15 }
 0x20d   : > { %2083 = vmatmul.msk.bf16.vlgmr.msra.gmra.mxu3 %vm781_vm14, %v778_v48 }
 0x27b   : > { %v913_v49 = vpop.permute.xlu1 %912 }
 0x27c   : > { %v918_v50 = vsel %vm892_vm15, %v913_v49, 0 }
 0x27d   : > { %927 = vmatpush.bf16.msrb.mxu1 %v918_v50 }
 0x288   : > { %v797_v51 = vpop.f32.mrf.mxu2 }
 0x289   : > { %v2997_v52 = vmul.f32 0.1, %v797_v51 }
 0x28b   : > { %v3001_v53 = vsel %vm781_vm14, %v2997_v52, -inf }
 0x28c   : > { %823 = vmax.xlane.f32.xlu2 %v3001_v53  ;;  %v846_v43 = vrot.slane %v3001_v53, 4 }
 0x28e   : > { %v847_v45 = vmax.f32 %v3001_v53, %v846_v43 }
 0x290   : > { %v799_v54 = vpop.f32.mrf.mxu2  ;;  %v816_v55 = vpop.f32.mrf.mxu3  ;;  %v848_v48 = vrot.slane %v847_v45, 2 }
 0x291   : > { %v3004_v56 = vmul.f32 0.1, %v816_v55 }
 0x292   : > { %v849_v50 = vmax.f32 %v847_v45, %v848_v48 }
 0x293   : > { %v3008_v57 = vsel %vm781_vm14, %v3004_v56, -inf }
 0x294   : > { %826 = vmax.xlane.f32.xlu0 %v3008_v57  ;;  %v852_v44 = vrot.slane %v3008_v57, 4 }
 0x296   : > { %v853_v46 = vmax.f32 %v3008_v57, %v852_v44 }
 0x298   : > { %v818_v58 = vpop.f32.mrf.mxu3  ;;  %v854_v49 = vrot.slane %v853_v46, 2 }
 0x299   : > { %v850_v58 = vrot.slane %v849_v50, 1 }
 0x29a   : > { %v855_v51 = vmax.f32 %v853_v46, %v854_v49 }
 0x2a4   : > { %1015 = vrot.lane.b32.xlu2 %v3011_v60, %s2690_s23 }
 0x2a8   : > { %887 = vrot.lane.b32.xlu0 %v3011_v60, %s2689_s15 }
 0x2b0   : > { %1038 = vrot.lane.b32.xlu0 %v2991_v47, %s2690_s23 }
 0x2ff   : > { %v824_v61 = vpop.xlane.xlu2 %823 }
 0x300   : > { %v828_v62 = vsub.f32 %v2997_v52, %v824_v61  ;;  %v856_v61 = vrot.slane %v855_v51, 1 }
 0x302   : > { %v830_v63 = vmul.f32 1.442695, %v828_v62  ;;  %v851_v62 = vmax.f32 %v849_v50, %v850_v58 }
 0x304   : > { %2316 = vpow2.f32 %v830_v63  ;;  %v857_v63 = vmax.f32 %v855_v51, %v856_v61  ;;  %v858_v53 = vsub.f32 %v2997_v52, %v851_v62 }
 0x307   : > { %v827_v0 = vpop.xlane.xlu0 %826  ;;  %v1016_v7 = vpop.permute.xlu2 %1015 }
 0x308   : > { %v829_v1 = vsub.f32 %v3004_v56, %v827_v0  ;;  %v1021_v10 = vsel %vm781_vm14, %v1016_v7, 0 }
 0x30a   : > { %v2317_v2 = vpop.eup %2316  ;;  %v832_v3 = vmul.f32 1.442695, %v829_v1 }
 0x30b   : > { %v834_v4 = vsel %vm781_vm14, %v2317_v2, 0.0 }
 0x30c   : > { %2318 = vpow2.f32 %v832_v3  ;;  %835 = vadd.xlane.f32.xlu1 %v834_v4  ;;  %v859_v3 = vsub.f32 %v3004_v56, %v857_v63 }
 0x312   : > { %v2319_v5 = vpop.eup %2318 }
 0x313   : > { %v837_v6 = vsel %vm781_vm14, %v2319_v5, 0.0 }
 0x314   : > { %838 = vadd.xlane.f32.xlu2 %v837_v6  ;;  %v862_v6 = vmul.f32 1.442695, %v859_v3 }
 0x31a   : > { %v888_v8 = vpop.permute.xlu0 %887 }
 0x31b   : > { %v894_v9 = vsel %vm892_vm15, %v888_v8, 0 }
 0x31c   : > { %903 = vmatpush.bf16.msrb.mxu0 %v894_v9 }
 0x320   : > { %1030 = vmatpush.bf16.xpose.msra.mxu0 %v1021_v10 }
 0x322   : > { %v1039_v12 = vpop.permute.xlu0 %1038 }
 0x323   : > { %v1044_v14 = vsel %vm781_vm14, %v1039_v12, 0 }
 0x324   : > { %1053 = vmatpush.bf16.xpose.msra.mxu1 %v1044_v14 }
 0x325   : > { %1036 = vrot.lane.b32.xlu1 %v3025_v13, %s2690_s23 }
 0x32c   : > { %1013 = vrot.lane.b32.xlu2 %v3030_v16, %s2690_s23  ;;  %s2584_s23 = scalar_lea.hbm %s3329_s12, 64 }
 0x32d   : > { %952 = vrot.lane.b32.xlu1 %v3030_v16, %s2689_s15 }
 0x335   : > { %992 = vrot.lane.b32.xlu1 %v3025_v13, %s2689_s15 }
 0x37f   : > { %v836_v17 = vpop.xlane.xlu1 %835 }
 0x380   : > { %2320 = vrcp.f32 %v836_v17 }
 0x386   : > { %v2321_v18 = vpop.eup %2320 }
 0x387   : > { %v842_v19 = vmul.f32 %v2321_v18, %v2317_v2  ;;  %v839_v21 = vpop.xlane.xlu2 %838 }
 0x388   : > { %2322 = vrcp.f32 %v839_v21 }
 0x389   : > { %v844_v22 = vpack.c.bf16 %v842_v19, %v842_v19 }
 0x38b   : > { %2084 = vmatmul.msk.bf16.vlgmr.msrb.gmra.mxu0 %vm781_vm14, %v844_v22 }
 0x38e   : > { %v2323_v23 = vpop.eup %2322 }
 0x38f   : > { %v843_v24 = vmul.f32 %v2323_v23, %v2319_v5  ;;  %v1014_v26 = vpop.permute.xlu2 %1013  ;;  %v860_v5 = vmul.f32 1.442695, %v858_v53 }
 0x391   : > { %v845_v25 = vpack.c.bf16 %v843_v24, %v843_v24 }
 0x393   : > { %2085 = vmatmul.msk.bf16.vlgmr.msrb.gmra.mxu1 %vm781_vm14, %v845_v25 }
 0x397   : > { %v1037_v20 = vpop.permute.xlu1 %1036 }
 0x39b   : > { %2088 = vmatmul.msk.bf16.vlgmr.msra.gmra.mxu0 %vm781_vm14, %v1014_v26 }
 0x39f   : > { %v953_v27 = vpop.permute.xlu1 %952 }
 0x3a0   : > { %v958_v28 = vsel %vm892_vm15, %v953_v27, 0 }
 0x3a1   : > { %967 = vmatpush.bf16.msrb.mxu2 %v958_v28 }
 0x3a3   : > { %2089 = vmatmul.msk.bf16.vlgmr.msra.gmra.mxu1 %vm781_vm14, %v1037_v20 }
 0x3a7   : > { %v993_v31 = vpop.permute.xlu1 %992 }
 0x3a8   : > { %v998_v32 = vsel %vm892_vm15, %v993_v31, 0 }
 0x3a9   : > { %1007 = vmatpush.bf16.msrb.mxu3 %v998_v32 }
 0x408   : > { %v3044_v29 = vpop.f32.mrf.mxu0 }
 0x410   : > { %v907_v33 = vpop.f32.mrf.mxu0  ;;  %v3046_v34 = vpop.f32.mrf.mxu1 }
 0x418   : > { %v931_v30 = vpop.f32.mrf.mxu1  ;;  %v1032_v35 = vpop.f32.mrf.mxu0 }
 0x419   : > { %v3048_v36 = vmul.f32 0.1, %v1032_v35 }
 0x41b   : > { %v3052_v37 = vsel %vm781_vm14, %v3048_v36, -inf }
 0x41c   : > { %1062 = vmax.xlane.f32.xlu0 %v3052_v37 }
 0x420   : > { %v1034_v38 = vpop.f32.mrf.mxu0  ;;  %v1055_v39 = vpop.f32.mrf.mxu1 }
 0x421   : > { %v3055_v40 = vmul.f32 0.1, %v1055_v39 }
 0x423   : > { %v3059_v41 = vsel %vm781_vm14, %v3055_v40, -inf }
 0x424   : > { %1065 = vmax.xlane.f32.xlu2 %v3059_v41 }
 0x428   : > { %v1057_v42 = vpop.f32.mrf.mxu1 }
 0x430   : > { %1144 = vrot.lane.b32.xlu0 %v2991_v47, %s2691_s30 }
 0x438   : > { %1264 = vrot.lane.b32.xlu0 %v2991_v47, %s2692_s27 }
 0x43c   : > { %1123 = vrot.lane.b32.xlu2 %v3011_v60, %s2691_s30 }
 0x444   : > { %1241 = vrot.lane.b32.xlu2 %v3011_v60, %s2692_s27 }
 0x44c   : > { %1239 = vrot.lane.b32.xlu2 %v3030_v16, %s2692_s27 }
 0x454   : > { %1218 = vrot.lane.b32.xlu2 %v3025_v13, %s2691_s30 }
 0x48f   : > { %v1063_v54 = vpop.xlane.xlu0 %1062 }
 0x490   : > { %v1067_v55 = vsub.f32 %v3048_v36, %v1063_v54 }
 0x492   : > { %v1069_v59 = vmul.f32 1.442695, %v1067_v55 }
 0x494   : > { %2324 = vpow2.f32 %v1069_v59 }
 0x497   : > { %v1066_v0 = vpop.xlane.xlu2 %1065 }
 0x498   : > { %v1068_v1 = vsub.f32 %v3055_v40, %v1066_v0 }
 0x49a   : > { %v3080_v2 = vpop.eup %2324  ;;  %v1071_v57 = vmul.f32 1.442695, %v1068_v1 }
 0x49b   : > { %v1073_v4 = vsel %vm781_vm14, %v3080_v2, 0.0 }
 0x49c   : > { %2326 = vpow2.f32 %v1071_v57  ;;  %1074 = vadd.xlane.f32.xlu1 %v1073_v4 }
 0x49d   : > { %2328 = vpow2.f32 %v860_v5 }
 0x49e   : > { %2330 = vpow2.f32 %v862_v6 }
 0x49f   : > { %v1124_v7 = vpop.permute.xlu2 %1123 }
 0x4a0   : > { %v1129_v8 = vsel %vm892_vm15, %v1124_v7, 0 }
 0x4a1   : > { %1138 = vmatpush.bf16.msra.mxu2 %v1129_v8 }
 0x4a2   : > { %v3087_v9 = vpop.eup %2326  ;;  %v1145_v10 = vpop.permute.xlu0 %1144 }
 0x4a3   : > { %v1150_v52 = vsel %vm892_vm15, %v1145_v10, 0  ;;  %v1076_v56 = vsel %vm781_vm14, %v3087_v9, 0.0  ;;  %v2329_v12 = vpop.eup %2328  ;;  %v1085_v10 = vrot.slane %v3052_v37, 4 }
 0x4a4   : > { %1077 = vadd.xlane.f32.xlu0 %v1076_v56  ;;  %1159 = vmatpush.bf16.msra.mxu3 %v1150_v52  ;;  %v2331_v14 = vpop.eup %2330  ;;  %v864_v15 = vsel %vm781_vm14, %v2329_v12, 0.0  ;;  %v1091_v52 = vrot.slane %v3059_v41, 4 }
 0x4a5   : > { %v871_v17 = vsel %vm781_vm14, %v2331_v14, 0.0  ;;  %v865_v18 = vrot.slane %v864_v15, 4 }
 0x4a6   : > { %v872_v21 = vrot.slane %v871_v17, 4 }
 0x4a7   : > { %v1242_v11 = vpop.permute.xlu2 %1241  ;;  %v866_v22 = vadd.f32 %v865_v18, %v864_v15 }
 0x4a8   : > { %v873_v23 = vadd.f32 %v872_v21, %v871_v17  ;;  %v1247_v49 = vsel %vm781_vm14, %v1242_v11, 0 }
 0x4a9   : > { %v867_v24 = vrot.slane %v866_v22, 2 }
 0x4aa   : > { %v874_v20 = vrot.slane %v873_v23, 2  ;;  %v1265_v46 = vpop.permute.xlu0 %1264 }
 0x4ab   : > { %v868_v27 = vadd.f32 %v867_v24, %v866_v22  ;;  %v1270_v55 = vsel %vm781_vm14, %v1265_v46, 0 }
 0x4ac   : > { %v875_v28 = vadd.f32 %v874_v20, %v873_v23 }
 0x4ad   : > { %v869_v31 = vrot.slane %v868_v27, 1 }
 0x4ae   : > { %v876_v32 = vrot.slane %v875_v28, 1 }
 0x4af   : > { %v1240_v19 = vpop.permute.xlu2 %1239  ;;  %v870_v33 = vadd.f32 %v869_v31, %v868_v27 }
 0x4b0   : > { %v877_v30 = vadd.f32 %v876_v32, %v875_v28 }
 0x4b1   : > { %2332 = vrcp.f32 %v870_v33 }
 0x4b2   : > { %2334 = vrcp.f32 %v877_v30 }
 0x4b7   : > { %v1219_v25 = vpop.permute.xlu2 %1218  ;;  %v2333_v35 = vpop.eup %2332 }
 0x4b8   : > { %v1224_v26 = vsel %vm892_vm15, %v1219_v25, 0  ;;  %1262 = vrot.lane.b32.xlu0 %v3025_v13, %s2692_s27  ;;  %v2335_v38 = vpop.eup %2334  ;;  %v880_v39 = vmul.f32 %v2333_v35, %v2329_v12  ;;  %v1086_v12 = vmax.f32 %v3052_v37, %v1085_v10  ;;  %s1855_s27 = sshll.u32 %s572_s10, 4  ;;  %s1856_s27 = int_to_ptr.vmem [resolvable:$true] %s1855_s27 }
 0x4b9   : > { %1233 = vmatpush.bf16.msrb.mxu1 %v1224_v26  ;;  %v881_v42 = vmul.f32 %v2335_v38, %v2331_v14  ;;  %v1092_v14 = vmax.f32 %v3059_v41, %v1091_v52 }
 0x4ba   : > { %v882_v43 = vpack.c.bf16 %v880_v39, %v880_v39  ;;  %v1087_v15 = vrot.slane %v1086_v12, 2 }
 0x4bb   : > { %v883_v44 = vpack.c.bf16 %v881_v42, %v881_v42  ;;  %v1093_v17 = vrot.slane %v1092_v14, 2 }
 0x4bc   : > { %v1088_v22 = vmax.f32 %v1086_v12, %v1087_v15 }
 0x4bd   : > { %v1094_v23 = vmax.f32 %v1092_v14, %v1093_v17 }
 0x4be   : > { %v1089_v24 = vrot.slane %v1088_v22, 1 }
 0x4bf   : > { %v1095_v25 = vrot.slane %v1094_v23, 1 }
 0x4c0   : > { %1349 = vrot.lane.b32.xlu0 %v3011_v60, %s2693_s22  ;;  %v1090_v28 = vmax.f32 %v1088_v22, %v1089_v24 }
 0x4c1   : > { %v1096_v37 = vmax.f32 %v1094_v23, %v1095_v25 }
 0x4c2   : > { %v1097_v31 = vsub.f32 %v3048_v36, %v1090_v28 }
 0x4c3   : > { %v1098_v32 = vsub.f32 %v3055_v40, %v1096_v37 }
 0x4c4   : > { %v1099_v38 = vmul.f32 1.442695, %v1097_v31 }
 0x4c5   : > { %v1101_v39 = vmul.f32 1.442695, %v1098_v32 }
 0x4c8   : > { %1467 = vrot.lane.b32.xlu0 %v3011_v60, %s2694_s0 }
 0x4d0   : > { %1490 = vrot.lane.b32.xlu0 %v2991_v47, %s2694_s0 }
 0x4d6   : > { %2258 = vxpose.binary.xlu1.c.b16.start.end [1/2] (short) (narrow) %v883_v44, %v882_v43, 16 }
 0x50f   : > { %v1075_v45 = vpop.xlane.xlu1 %1074 }
 0x510   : > { %2336 = vrcp.f32 %v1075_v45 }
 0x516   : > { %v2337_v51 = vpop.eup %2336 }
 0x517   : > { %v1078_v50 = vpop.xlane.xlu0 %1077  ;;  %v1081_v58 = vmul.f32 %v2337_v51, %v3080_v2 }
 0x518   : > { %2338 = vrcp.f32 %v1078_v50 }
 0x519   : > { %v1083_v59 = vpack.c.bf16 %v1081_v58, %v1081_v58  ;;  %2340 = vpow2.f32 %v1099_v38 }
 0x51a   : > { %2342 = vpow2.f32 %v1101_v39 }
 0x51e   : > { %v2339_v61 = vpop.eup %2338 }
 0x51f   : > { %v1082_v62 = vmul.f32 %v2339_v61, %v3087_v9  ;;  %v2341_v44 = vpop.eup %2340 }
 0x520   : > { %v2343_v45 = vpop.eup %2342  ;;  %v1103_v36 = vsel %vm781_vm14, %v2341_v44, 0.0 }
 0x521   : > { %v1084_v0 = vpack.c.bf16 %v1082_v62, %v1082_v62  ;;  %v1110_v40 = vsel %vm781_vm14, %v2343_v45, 0.0  ;;  %v1104_v46 = vrot.slane %v1103_v36, 4 }
 0x52a   : > { %v1263_v63 = vpop.permute.xlu0 %1262 }
 0x530   : > { %1181 = vrot.lane.b32.xlu1 %v3030_v16, %s2691_s30  ;;  %s1854_s30 = scalar_lea.hbm %s3329_s12, %s2142_s8 }
 0x532   : > { %v1350_v1 = vpop.permute.xlu0 %1349 }
 0x533   : > { %v1355_v3 = vsel %vm892_vm15, %v1350_v1, 0 }
 0x538   : > { %1407 = vrot.lane.b32.xlu1 %v3030_v16, %s2693_s22 }
 0x540   : > { %1444 = vrot.lane.b32.xlu1 %v3025_v13, %s2693_s22 }
 0x582   : > { %v2259_v48 = vpop.trf.xlu1 }
 0x583   : > { %2086 = vmatmul.msk.bf16.vlgmr.msrb.gmra.mxu2 %vm781_vm14, %v2259_v48  ;;  %v1111_v48 = vrot.slane %v1110_v40, 4 }
 0x584   : > { %1256 = vmatpush.bf16.xpose.msrb.mxu2 %v1247_v49  ;;  %v1105_v49 = vadd.f32 %v1104_v46, %v1103_v36 }
 0x585   : > { %v1112_v50 = vadd.f32 %v1111_v48, %v1110_v40 }
 0x586   : > { %v1106_v51 = vrot.slane %v1105_v49, 2 }
 0x58a   : > { %v2260_v54 = vpop.trf.xlu1 }
 0x58b   : > { %2087 = vmatmul.msk.bf16.vlgmr.msrb.gmra.mxu3 %vm781_vm14, %v2260_v54  ;;  %v1113_v54 = vrot.slane %v1112_v50, 2 }
 0x58c   : > { %1279 = vmatpush.bf16.xpose.msrb.mxu3 %v1270_v55  ;;  %v1107_v55 = vadd.f32 %v1106_v51, %v1105_v49 }
 0x58d   : > { %v1114_v58 = vadd.f32 %v1113_v54, %v1112_v50 }
 0x58f   : > { %v1115_v61 = vrot.slane %v1114_v58, 1 }
 0x593   : > { %2090 = vmatmul.msk.bf16.vlgmr.msra.gmra.mxu2 %vm781_vm14, %v1083_v59  ;;  %v1108_v59 = vrot.slane %v1107_v55, 1 }
 0x595   : > { %v1109_v62 = vadd.f32 %v1108_v59, %v1107_v55 }
 0x597   : > { %2344 = vrcp.f32 %v1109_v62 }
 0x59b   : > { %2091 = vmatmul.msk.bf16.vlgmr.msra.gmra.mxu3 %vm781_vm14, %v1084_v0 }
 0x59d   : > { %v2345_v0 = vpop.eup %2344 }
 0x5a2   : > { %v1182_v53 = vpop.permute.xlu1 %1181 }
 0x5a3   : > { %v1187_v57 = vsel %vm892_vm15, %v1182_v53, 0  ;;  %2094 = vmatmul.msk.bf16.vlgmr.msrb.gmra.mxu2 %vm781_vm14, %v1240_v19  ;;  %v1119_v53 = vmul.f32 %v2345_v0, %v2341_v44 }
 0x5a4   : > { %1196 = vmatpush.bf16.msrb.mxu0 %v1187_v57 }
 0x5a8   : > { %1364 = vmatpush.bf16.msra.mxu0 %v1355_v3  ;;  %v1121_v3 = vpack.c.bf16 %v1119_v53, %v1119_v53 }
 0x5aa   : > { %v1408_v2 = vpop.permute.xlu1 %1407 }
 0x5ab   : > { %v1413_v4 = vsel %vm892_vm15, %v1408_v2, 0  ;;  %2095 = vmatmul.msk.bf16.vlgmr.msrb.gmra.mxu3 %vm781_vm14, %v1263_v63  ;;  %v1116_v63 = vadd.f32 %v1115_v61, %v1114_v58 }
 0x5ac   : > { %1422 = vmatpush.bf16.msra.mxu2 %v1413_v4  ;;  %v1468_v4 = vpop.permute.xlu0 %1467 }
 0x5ad   : > { %2346 = vrcp.f32 %v1116_v63  ;;  %v1473_v25 = vsel %vm781_vm14, %v1468_v4, 0 }
 0x5b2   : > { %v1445_v5 = vpop.permute.xlu1 %1444 }
 0x5b3   : > { %v1450_v6 = vsel %vm892_vm15, %v1445_v5, 0  ;;  %v2347_v1 = vpop.eup %2346 }
 0x5b4   : > { %1459 = vmatpush.bf16.msra.mxu3 %v1450_v6  ;;  %v1120_v57 = vmul.f32 %v2347_v1, %v2343_v45  ;;  %v1491_v5 = vpop.permute.xlu0 %1490 }
 0x5b6   : > { %v1122_v2 = vpack.c.bf16 %v1120_v57, %v1120_v57 }
 0x606   : > { %v3123_v7 = vpop.f32.mrf.mxu2 }
 0x60e   : > { %v971_v8 = vpop.f32.mrf.mxu2  ;;  %v3125_v9 = vpop.f32.mrf.mxu3 }
 0x616   : > { %v1011_v56 = vpop.f32.mrf.mxu3  ;;  %v3129_v11 = vpop.f32.mrf.mxu2 }
 0x61e   : > { %v1142_v18 = vpop.f32.mrf.mxu2  ;;  %v3133_v19 = vpop.f32.mrf.mxu3 }
 0x61f   : > { %v2270_v21 = vpack.i.bf16 %v3133_v19, %v3129_v11 }
 0x626   : > { %v1163_v20 = vpop.f32.mrf.mxu3  ;;  %v1258_v26 = vpop.f32.mrf.mxu2 }
 0x627   : > { %v3137_v27 = vmul.f32 0.1, %v1258_v26  ;;  %v1496_v26 = vsel %vm781_vm14, %v1491_v5, 0 }
 0x629   : > { %v3141_v41 = vsel %vm781_vm14, %v3137_v27, -inf }
 0x62a   : > { %1288 = vmax.xlane.f32.xlu2 %v3141_v41 }
 0x62e   : > { %v1260_v33 = vpop.f32.mrf.mxu2  ;;  %v1281_v30 = vpop.f32.mrf.mxu3 }
 0x62f   : > { %v3146_v35 = vmul.f32 0.1, %v1281_v30 }
 0x631   : > { %v3150_v42 = vsel %vm781_vm14, %v3146_v35, -inf }
 0x632   : > { %1291 = vmax.xlane.f32.xlu0 %v3150_v42 }
 0x636   : > { %v1283_v43 = vpop.f32.mrf.mxu3 }
 0x642   : > { %1370 = vrot.lane.b32.xlu2 %v2991_v47, %s2693_s22  ;;  %s1857_s22 = sshll.u32 %s1854_s30, 4  ;;  %s1858_s22 = int_to_ptr.hbm [resolvable:$true] %s1857_s22 }
 0x643   : > { %s2578_s20 = sshra.s32 %s1858_s22, 4  ;;  %s2579_s20 = int_to_ptr.hbm [resolvable:$true] %s2578_s20 }
 0x644   : > { %s2580_s25 = scalar_lea.hbm %s2579_s20, 16  ;;  %p2585_p2 = scmp.lt.s32.totalorder %s2579_s20, %s3329_s12 }
 0x645   : > { %p2581_p1 = scmp.ne.s32.totalorder %s2579_s20, %s2580_s25  ;;  %p2586_p9 = scmp.lt.s32.totalorder %s2584_s23, %s2580_s25 }
 0x646   : > { %1465 = vrot.lane.b32.xlu0 %v3030_v16, %s2694_s0 }
 0x647   : > { %p2582_p4 = pnand %p2581_p1, %p2853_p0  ;;  %p2587_p7 = por %p2586_p9, %p2585_p2 }
 0x649   : > { %p2583_p8 = pneg %p2582_p4 }
 0x64b   : > { %p2588_p10 = pnand %p2587_p7, %p2583_p8 }
 0x668   : > { %2261 = vxpose.binary.xlu2.c.b16.start.end [1/2] (short) (narrow) %v1122_v2, %v1121_v3, 16 }
 0x69d   : > { %v1289_v6 = vpop.xlane.xlu2 %1288 }
 0x69e   : > { %v1293_v8 = vsub.f32 %v3137_v27, %v1289_v6  ;;  %v1311_v6 = vrot.slane %v3141_v41, 4 }
 0x6a0   : > { %v1295_v10 = vmul.f32 1.442695, %v1293_v8 }
 0x6a2   : > { %2348 = vpow2.f32 %v1295_v10  ;;  %v1312_v10 = vmax.f32 %v3141_v41, %v1311_v6 }
 0x6a5   : > { %v1371_v52 = vpop.permute.xlu2 %1370  ;;  %v1292_v56 = vpop.xlane.xlu0 %1291 }
 0x6a6   : > { %v1376_v12 = vsel %vm892_vm15, %v1371_v52, 0  ;;  %v1294_v14 = vsub.f32 %v3146_v35, %v1292_v56 }
 0x6a7   : > { %1385 = vmatpush.bf16.msra.mxu1 %v1376_v12 }
 0x6a8   : > { %v2349_v15 = vpop.eup %2348  ;;  %v1297_v17 = vmul.f32 1.442695, %v1294_v14 }
 0x6a9   : > { %v1299_v18 = vsel %vm781_vm14, %v2349_v15, 0.0 }
 0x6aa   : > { %2350 = vpow2.f32 %v1297_v17  ;;  %1300 = vadd.xlane.f32.xlu0 %v1299_v18 }
 0x6b0   : > { %v2351_v22 = vpop.eup %2350 }
 0x6b1   : > { %v1302_v23 = vsel %vm781_vm14, %v2351_v22, 0.0 }
 0x6b2   : > { %1303 = vadd.xlane.f32.xlu0 %v1302_v23 }
 0x6b8   : > { %v1466_v28 = vpop.permute.xlu0 %1465 }
 0x6c6   : > { %1488 = vrot.lane.b32.xlu0 %v3025_v13, %s2694_s0 }
 0x709   : > { %v2262_v24 = vpop.trf.xlu2 }
 0x70a   : > { %2092 = vmatmul.msk.bf16.vlgmr.msrb.gmra.mxu0 %vm781_vm14, %v2262_v24 }
 0x70b   : > { %1482 = vmatpush.bf16.xpose.msrb.mxu0 %v1473_v25 }
 0x711   : > { %v2263_v20 = vpop.trf.xlu2 }
 0x712   : > { %2093 = vmatmul.msk.bf16.vlgmr.msrb.gmra.mxu1 %vm781_vm14, %v2263_v20 }
 0x713   : > { %1505 = vmatpush.bf16.xpose.msrb.mxu1 %v1496_v26 }
 0x71d   : > { %v1301_v37 = vpop.xlane.xlu0 %1300 }
 0x71e   : > { %2352 = vrcp.f32 %v1301_v37 }
 0x724   : > { %v2353_v31 = vpop.eup %2352 }
 0x725   : > { %v1307_v32 = vmul.f32 %v2353_v31, %v2349_v15  ;;  %v1304_v33 = vpop.xlane.xlu0 %1303 }
 0x726   : > { %2354 = vrcp.f32 %v1304_v33 }
 0x727   : > { %v1309_v30 = vpack.c.bf16 %v1307_v32, %v1307_v32 }
 0x729   : > { %2096 = vmatmul.msk.bf16.vlgmr.msra.gmra.mxu0 %vm781_vm14, %v1309_v30 }
 0x72c   : > { %v2355_v38 = vpop.eup %2354 }
 0x72d   : > { %v1308_v39 = vmul.f32 %v2355_v38, %v2351_v22 }
 0x72f   : > { %v1310_v43 = vpack.c.bf16 %v1308_v39, %v1308_v39 }
 0x731   : > { %2097 = vmatmul.msk.bf16.vlgmr.msra.gmra.mxu1 %vm781_vm14, %v1310_v43 }
 0x738   : > { %v1489_v44 = vpop.permute.xlu0 %1488 }
 0x739   : > { %2100 = vmatmul.msk.bf16.vlgmr.msrb.gmra.mxu0 %vm781_vm14, %v1466_v28 }
 0x741   : > { %2101 = vmatmul.msk.bf16.vlgmr.msrb.gmra.mxu1 %vm781_vm14, %v1489_v44 }
 0x787   : > { %v3174_v45 = vpop.f32.mrf.mxu0 }
 0x78f   : > { %v1200_v36 = vpop.f32.mrf.mxu0  ;;  %v3176_v40 = vpop.f32.mrf.mxu1 }
 0x790   : > { %v2275_v46 = vpack.i.bf16 %v3176_v40, %v3174_v45 }
 0x797   : > { %v1237_v48 = vpop.f32.mrf.mxu1 }
 0x7a6   : > { %v3180_v49 = vpop.f32.mrf.mxu0 }
 0x7ae   : > { %v1368_v50 = vpop.f32.mrf.mxu0  ;;  %v3182_v51 = vpop.f32.mrf.mxu1 }
 0x7af   : > { %v2280_v54 = vpack.i.bf16 %v3182_v51, %v3180_v49 }
 0x7b6   : > { %v1389_v55 = vpop.f32.mrf.mxu1  ;;  %v1484_v58 = vpop.f32.mrf.mxu0 }
 0x7b7   : > { %v1511_v59 = vmul.f32 0.1, %v1484_v58 }
 0x7b9   : > { %v1513_v61 = vsel %vm781_vm14, %v1511_v59, -inf }
 0x7ba   : > { %1514 = vmax.xlane.f32.xlu0 %v1513_v61  ;;  %v1537_v57 = vrot.slane %v1513_v61, 4 }
 0x7bc   : > { %v1538_v2 = vmax.f32 %v1513_v61, %v1537_v57 }
 0x7be   : > { %v1486_v62 = vpop.f32.mrf.mxu0  ;;  %v1507_v63 = vpop.f32.mrf.mxu1  ;;  %v1539_v5 = vrot.slane %v1538_v2, 2 }
 0x7bf   : > { %v1512_v0 = vmul.f32 0.1, %v1507_v63 }
 0x7c0   : > { %v1540_v8 = vmax.f32 %v1538_v2, %v1539_v5 }
 0x7c1   : > { %v1516_v1 = vsel %vm781_vm14, %v1512_v0, -inf }
 0x7c2   : > { %1517 = vmax.xlane.f32.xlu2 %v1516_v1  ;;  %v1543_v3 = vrot.slane %v1516_v1, 4  ;;  %v1541_v19 = vrot.slane %v1540_v8, 1 }
 0x7c4   : > { %v1544_v4 = vmax.f32 %v1516_v1, %v1543_v3  ;;  %v1542_v56 = vmax.f32 %v1540_v8, %v1541_v19 }
 0x7c6   : > { %v1509_v53 = vpop.f32.mrf.mxu1  ;;  %v1549_v22 = vsub.f32 %v1511_v59, %v1542_v56 }
 0x7c8   : > { %v1551_v41 = vmul.f32 1.442695, %v1549_v22 }
 0x7ce   : > { %1575 = vrot.lane.b32.xlu0 %v3011_v60, %s2695_s6  ;;  %v1545_v60 = vrot.slane %v1544_v4, 2 }
 0x7d0   : > { %v1546_v52 = vmax.f32 %v1544_v4, %v1545_v60 }
 0x7d6   : > { %1596 = vrot.lane.b32.xlu0 %v2991_v47, %s2695_s6  ;;  %v1317_v47 = vrot.slane %v3150_v42, 4 }
 0x7d8   : > { %v1318_v11 = vmax.f32 %v3150_v42, %v1317_v47 }
 0x7da   : > { %2271 = vrot.lane.b32.xlu2 %v2270_v21, %s2696_s19  ;;  %v1547_v21 = vrot.slane %v1546_v52, 1 }
 0x7dc   : > { %v1548_v14 = vmax.f32 %v1546_v52, %v1547_v21 }
 0x7de   : > { %1633 = vrot.lane.b32.xlu0 %v3030_v16, %s2695_s6  ;;  %v1313_v16 = vrot.slane %v1312_v10, 2  ;;  %v1550_v24 = vsub.f32 %v1512_v0, %v1548_v14 }
 0x7e0   : > { %v1314_v12 = vmax.f32 %v1312_v10, %v1313_v16  ;;  %v1553_v28 = vmul.f32 1.442695, %v1550_v24 }
 0x7e2   : > { %v1315_v23 = vrot.slane %v1314_v12, 1 }
 0x7e4   : > { %v1316_v26 = vmax.f32 %v1314_v12, %v1315_v23 }
 0x7e6   : > { %1670 = vrot.lane.b32.xlu0 %v3025_v13, %s2695_s6  ;;  %v1319_v13 = vrot.slane %v1318_v11, 2  ;;  %v1323_v33 = vsub.f32 %v3137_v27, %v1316_v26 }
 0x7e8   : > { %v1320_v15 = vmax.f32 %v1318_v11, %v1319_v13  ;;  %v1325_v43 = vmul.f32 1.442695, %v1323_v33 }
 0x7ea   : > { %v1321_v20 = vrot.slane %v1320_v15, 1 }
 0x7ec   : > { %v1322_v42 = vmax.f32 %v1320_v15, %v1321_v20 }
 0x7ee   : > { %v1324_v38 = vsub.f32 %v3146_v35, %v1322_v42 }
 0x7f0   : > { %v1327_v36 = vmul.f32 1.442695, %v1324_v38 }
 0x82d   : > { %v1515_v17 = vpop.xlane.xlu0 %1514 }
 0x82e   : > { %v1519_v18 = vsub.f32 %v1511_v59, %v1515_v17 }
 0x830   : > { %v1521_v25 = vmul.f32 1.442695, %v1519_v18 }
 0x832   : > { %2356 = vpow2.f32 %v1521_v25 }
 0x833   : > { %2358 = vpow2.f32 %v1551_v41 }
 0x834   : > { %2360 = vpow2.f32 %v1553_v28 }
 0x835   : > { %v1518_v37 = vpop.xlane.xlu2 %1517 }
 0x836   : > { %v1520_v31 = vsub.f32 %v1512_v0, %v1518_v37 }
 0x838   : > { %v3200_v32 = vpop.eup %2356  ;;  %v1523_v30 = vmul.f32 1.442695, %v1520_v31 }
 0x839   : > { %v1525_v39 = vsel %vm781_vm14, %v3200_v32, 0.0  ;;  %v2359_v44 = vpop.eup %2358 }
 0x83a   : > { %2362 = vpow2.f32 %v1523_v30  ;;  %1526 = vadd.xlane.f32.xlu1 %v1525_v39  ;;  %v2361_v48 = vpop.eup %2360  ;;  %v1555_v58 = vsel %vm781_vm14, %v2359_v44, 0.0 }
 0x83b   : > { %2364 = vpow2.f32 %v1325_v43  ;;  %v1562_v59 = vsel %vm781_vm14, %v2361_v48, 0.0  ;;  %v1556_v61 = vrot.slane %v1555_v58, 4 }
 0x83c   : > { %2366 = vpow2.f32 %v1327_v36  ;;  %v1563_v62 = vrot.slane %v1562_v59, 4 }
 0x83d   : > { %v1557_v1 = vadd.f32 %v1556_v61, %v1555_v58 }
 0x83e   : > { %v1564_v57 = vadd.f32 %v1563_v62, %v1562_v59 }
 0x83f   : > { %v1558_v5 = vrot.slane %v1557_v1, 2 }
 0x840   : > { %v3206_v50 = vpop.eup %2362  ;;  %v1576_v55 = vpop.permute.xlu0 %1575  ;;  %v1565_v60 = vrot.slane %v1564_v57, 2 }
 0x841   : > { %v1581_v27 = vsel %vm892_vm15, %v1576_v55, 0  ;;  %v1528_v35 = vsel %vm781_vm14, %v3206_v50, 0.0  ;;  %v2365_v63 = vpop.eup %2364  ;;  %v1559_v8 = vadd.f32 %v1558_v5, %v1557_v1 }
 0x842   : > { %1529 = vadd.xlane.f32.xlu0 %v1528_v35  ;;  %1590 = vmatpush.bf16.msrb.mxu2 %v1581_v27  ;;  %v2367_v0 = vpop.eup %2366  ;;  %v1329_v3 = vsel %vm781_vm14, %v2365_v63, 0.0  ;;  %v1566_v11 = vadd.f32 %v1565_v60, %v1564_v57 }
 0x843   : > { %v1336_v4 = vsel %vm781_vm14, %v2367_v0, 0.0  ;;  %v1330_v6 = vrot.slane %v1329_v3, 4  ;;  %v1560_v21 = vrot.slane %v1559_v8, 1 }
 0x844   : > { %v1337_v47 = vrot.slane %v1336_v4, 4  ;;  %v1567_v13 = vrot.slane %v1566_v11, 1 }
 0x845   : > { %v1331_v10 = vadd.f32 %v1330_v6, %v1329_v3  ;;  %v1561_v14 = vadd.f32 %v1560_v21, %v1559_v8  ;;  %v2141_v8 = vld [vmem:[#allocation11 + $0x8] sm:$0xff] }
 0x846   : > { %v1338_v19 = vadd.f32 %v1337_v47, %v1336_v4  ;;  %v1568_v17 = vadd.f32 %v1567_v13, %v1566_v11  ;;  %v2139_v47 = vld [vmem:[#allocation10 + $0x8] sm:$0xff]  ;;  %v2272_v11 = vpop.permute.xlu2 %2271 }
 0x847   : > { %v1332_v56 = vrot.slane %v1331_v10, 2  ;;  %2368 = vrcp.f32 %v1561_v14  ;;  %v2274_v21 = vunpack.i.h.bf16 %v2272_v11  ;;  %v2273_v13 = vunpack.i.l.bf16 %v2272_v11 }
 0x848   : > { %v1597_v53 = vpop.permute.xlu0 %1596  ;;  %v1339_v12 = vrot.slane %v1338_v19, 2  ;;  %2370 = vrcp.f32 %v1568_v17 }
 0x849   : > { %v1602_v2 = vsel %vm892_vm15, %v1597_v53, 0  ;;  %v1333_v18 = vadd.f32 %v1332_v56, %v1331_v10  ;;  %v2138_v10 = vld [vmem:[#allocation10] sm:$0xff]  ;;  %v1715_v17 = vsel %vm781_vm14, %v3044_v29, %v2273_v13 }
 0x84a   : > { %1611 = vmatpush.bf16.msrb.mxu3 %v1602_v2  ;;  %v1340_v23 = vadd.f32 %v1339_v12, %v1338_v19 }
 0x84b   : > { %v1334_v24 = vrot.slane %v1333_v18, 1 }
 0x84c   : > { %v1341_v25 = vrot.slane %v1340_v23, 1 }
 0x84d   : > { %v1335_v20 = vadd.f32 %v1334_v24, %v1333_v18  ;;  %v2369_v41 = vpop.eup %2368 }
 0x84e   : > { %v1342_v26 = vadd.f32 %v1341_v25, %v1340_v23  ;;  %v2371_v28 = vpop.eup %2370  ;;  %v1571_v42 = vmul.f32 %v2369_v41, %v2359_v44 }
 0x84f   : > { %2372 = vrcp.f32 %v1335_v20  ;;  %v1572_v37 = vmul.f32 %v2371_v28, %v2361_v48 }
 0x850   : > { %v1634_v52 = vpop.permute.xlu0 %1633  ;;  %2374 = vrcp.f32 %v1342_v26  ;;  %v1573_v31 = vpack.c.bf16 %v1571_v42, %v1571_v42 }
 0x851   : > { %v1639_v16 = vsel %vm892_vm15, %v1634_v52, 0  ;;  %v1574_v33 = vpack.c.bf16 %v1572_v37, %v1572_v37  ;;  %v2140_v52 = vld [vmem:[#allocation11] sm:$0xff] }
 0x852   : > { %1648 = vmatpush.bf16.msra.mxu0 %v1639_v16 }
 0x855   : > { %v2373_v30 = vpop.eup %2372 }
 0x856   : > { %v2375_v38 = vpop.eup %2374  ;;  %v1345_v39 = vmul.f32 %v2373_v30, %v2365_v63 }
 0x857   : > { %v1346_v43 = vmul.f32 %v2375_v38, %v2367_v0 }
 0x858   : > { %v1671_v15 = vpop.permute.xlu0 %1670  ;;  %v1347_v36 = vpack.c.bf16 %v1345_v39, %v1345_v39 }
 0x859   : > { %v1676_v22 = vsel %vm892_vm15, %v1671_v15, 0  ;;  %v1348_v55 = vpack.c.bf16 %v1346_v43, %v1346_v43  ;;  %v1716_v15 = vsel %vm781_vm14, %v3046_v34, %v2274_v21 }
 0x85a   : > { %1685 = vmatpush.bf16.msra.mxu1 %v1676_v22 }
 0x86b   : > { %2267 = vxpose.binary.xlu0.c.b16.start.end [1/2] (short) (narrow) %v1574_v33, %v1573_v31, 16 }
 0x874   : > { %2264 = vxpose.binary.xlu1.c.b16.start.end [1/2] (short) (narrow) %v1348_v55, %v1347_v36, 16 }
 0x8ad   : > { %v1527_v58 = vpop.xlane.xlu1 %1526 }
 0x8ae   : > { %2376 = vrcp.f32 %v1527_v58  ;;  %v2380_v58 = vld [vmem:[%s2916_s24] sm:$0xff] }
 0x8b4   : > { %v2377_v59 = vpop.eup %2376 }
 0x8b5   : > { %v1530_v44 = vpop.xlane.xlu0 %1529  ;;  %v1533_v45 = vmul.f32 %v2377_v59, %v3200_v32 }
 0x8b6   : > { %2378 = vrcp.f32 %v1530_v44 }
 0x8b7   : > { %v1535_v40 = vpack.c.bf16 %v1533_v45, %v1533_v45 }
 0x8ce   : > { %2281 = vrot.lane.b32.xlu1 %v2280_v54, %s2697_s14 }
 0x8d9   : > { %2276 = vrot.lane.b32.xlu0 %v2275_v46, %s2696_s19  ;;  %v2379_v46 = vpop.eup %2378 }
 0x8da   : > { %v1534_v51 = vmul.f32 %v2379_v46, %v3206_v50  ;;  %v2381_v46 = vld [vmem:[%s2916_s24 + $0x8] sm:$0xff] }
 0x8dc   : > { %v1536_v54 = vpack.c.bf16 %v1534_v51, %v1534_v51 }
 0x917   : > { %v2268_v48 = vpop.trf.xlu0 }
 0x918   : > { %2104 = vmatmul.msk.bf16.vlgmr.msra.gmra.mxu0 %vm781_vm14, %v2268_v48 }
 0x91f   : > { %v2269_v27 = vpop.trf.xlu0 }
 0x920   : > { %v2265_v35 = vpop.trf.xlu1  ;;  %2105 = vmatmul.msk.bf16.vlgmr.msra.gmra.mxu1 %vm781_vm14, %v2269_v27 }
 0x921   : > { %2098 = vmatmul.msk.bf16.vlgmr.msra.gmra.mxu2 %vm781_vm14, %v2265_v35  ;;  %v2305_v35 = vld [vmem:[%s3328_s11] ss:$0 sm:$0xff] }
 0x922   : > { %1783 = vmatpush.bf16.msra.mxu2 %v2139_v47 }
 0x926   : > { %1784 = vmatpush.bf16.msra.mxu2 %v2138_v10 }
 0x928   : > { %v2266_v49 = vpop.trf.xlu1 }
 0x929   : > { %2099 = vmatmul.msk.bf16.vlgmr.msra.gmra.mxu3 %vm781_vm14, %v2266_v49 }
 0x92a   : > { %1821 = vmatpush.bf16.msra.mxu3 %v2141_v8 }
 0x92e   : > { %1822 = vmatpush.bf16.msra.mxu3 %v2140_v52 }
 0x931   : > { %2102 = vmatmul.msk.bf16.vlgmr.msrb.gmra.mxu2 %vm781_vm14, %v1535_v40 }
 0x939   : > { %2103 = vmatmul.msk.bf16.vlgmr.msrb.gmra.mxu3 %vm781_vm14, %v1536_v54  ;;  %v2382_v54 = vld [vmem:[%s2924_s13] sm:$0xff] }
 0x940   : > { %v2282_v16 = vpop.permute.xlu1 %2281 }
 0x941   : > { %v2284_v56 = vunpack.i.h.bf16 %v2282_v16  ;;  %v2283_v12 = vunpack.i.l.bf16 %v2282_v16 }
 0x943   : > { %v1719_v23 = vsel %vm1717_vm1, %v1716_v15, %v2284_v56  ;;  %v1718_v24 = vsel %vm1717_vm1, %v1715_v17, %v2283_v12 }
 0x94b   : > { %v2277_v25 = vpop.permute.xlu0 %2276 }
 0x94c   : > { %v2279_v28 = vunpack.i.h.bf16 %v2277_v25  ;;  %v2278_v42 = vunpack.i.l.bf16 %v2277_v25 }
 0x94e   : > { %v1748_v34 = vsel %vm781_vm14, %v3125_v9, %v2279_v28  ;;  %v1747_v33 = vsel %vm781_vm14, %v3123_v7, %v2278_v42  ;;  %v2304_v9 = vld [vmem:[%s3326_s9] ss:$0 sm:$0xff] }
 0x995   : > { %v1650_v61 = vpop.f32.mrf.mxu0 }
 0x99d   : > { %v1652_v62 = vpop.f32.mrf.mxu0  ;;  %v1687_v63 = vpop.f32.mrf.mxu1 }
 0x99e   : > { %v2295_v60 = vpack.i.bf16 %v1687_v63, %v1650_v61 }
 0x9a4   : > { %v1424_v0 = vpop.f32.mrf.mxu2 }
 0x9a5   : > { %v1689_v1 = vpop.f32.mrf.mxu1 }
 0x9ac   : > { %v1426_v53 = vpop.f32.mrf.mxu2  ;;  %v1461_v57 = vpop.f32.mrf.mxu3 }
 0x9ad   : > { %v2285_v3 = vpack.i.bf16 %v1461_v57, %v1424_v0 }
 0x9af   : > { %2286 = vrot.lane.b32.xlu2 %v2285_v3, %s2697_s14  ;;  %s3365_s14 = sld [smem:[#allocation34_spill]] }
 0x9b4   : > { %v1463_v32 = vpop.f32.mrf.mxu3  ;;  %v1592_v2 = vpop.f32.mrf.mxu2 }
 0x9bc   : > { %v1594_v4 = vpop.f32.mrf.mxu2  ;;  %v1613_v5 = vpop.f32.mrf.mxu3 }
 0x9bd   : > { %v2290_v6 = vpack.i.bf16 %v1613_v5, %v1592_v2 }
 0x9bf   : > { %2291 = vrot.lane.b32.xlu2 %v2290_v6, %s2698_s21 }
 0x9c4   : > { %v1615_v50 = vpop.f32.mrf.mxu3 }
 0x9c7   : > { %2296 = vrot.lane.b32.xlu2 %v2295_v60, %s2698_s21  ;;  %s1871_s21 = scalar_lea.hbm %s3365_s14, %s2142_s8 }
 0xa09   : > { %v2287_v19 = vpop.permute.xlu2 %2286 }
 0xa0a   : > { %v2289_v37 = vunpack.i.h.bf16 %v2287_v19  ;;  %v2288_v31 = vunpack.i.l.bf16 %v2287_v19 }
 0xa0c   : > { %v1750_v39 = vsel %vm1717_vm1, %v1748_v34, %v2289_v37  ;;  %v1749_v43 = vsel %vm1717_vm1, %v1747_v33, %v2288_v31 }
 0xa19   : > { %v2292_v14 = vpop.permute.xlu2 %2291 }
 0xa1a   : > { %v2294_v18 = vunpack.i.h.bf16 %v2292_v14  ;;  %v2293_v22 = vunpack.i.l.bf16 %v2292_v14 }
 0xa1c   : > { %v1721_v20 = vsel %vm1720_vm2, %v1718_v24, %v2293_v22  ;;  %v1722_v41 = vsel %vm1720_vm2, %v1719_v23, %v2294_v18 }
 0xa1d   : > { %v1753_v26 = vpack.c.bf16 %v1722_v41, %v1721_v20 }
 0xa1f   : > { %2114 = vmatmul.msk.bf16.vlgmr.msra.gmra.mxu2 %vm591_vm0, %v1753_v26 }
 0xa21   : > { %v2297_v29 = vpop.permute.xlu2 %2296 }
 0xa22   : > { %v2299_v30 = vunpack.i.h.bf16 %v2297_v29  ;;  %v2298_v38 = vunpack.i.l.bf16 %v2297_v29 }
 0xa24   : > { %v1752_v36 = vsel %vm1720_vm2, %v1750_v39, %v2299_v30  ;;  %v1751_v55 = vsel %vm1720_vm2, %v1749_v43, %v2298_v38 }
 0xa25   : > { %v1791_v44 = vpack.c.bf16 %v1752_v36, %v1751_v55 }
 0xa27   : > { %2123 = vmatmul.msk.bf16.vlgmr.msra.gmra.mxu3 %vm591_vm0, %v1791_v44 }
 0xaa2   : > { %v1786_v48 = vpop.f32.mrf.mxu2 }
 0xaa3   : > { %v1787_v7 = vadd.f32 %v2304_v9, %v1786_v48 }
 0xaa5   : > { %v1829_v27 = vadd.f32 %v2380_v58, %v1787_v7 }
 0xaa7   : > { %1831 = vst.msk [vmem:[%s572_s10] sm:$0xff] %vm591_vm0, %v1829_v27 }
 0xaaa   : > { %v1788_v59 = vpop.f32.mrf.mxu2  ;;  %v1824_v49 = vpop.f32.mrf.mxu3 }
 0xaab   : > { %v1789_v45 = vadd.f32 %v2304_v9, %v1788_v59  ;;  %v1825_v40 = vadd.f32 %v2305_v35, %v1824_v49 }
 0xaad   : > { %v1830_v51 = vadd.f32 %v2381_v46, %v1789_v45  ;;  %v1833_v61 = vadd.f32 %v2382_v54, %v1825_v40 }
 0xaaf   : > { %1832 = vst.msk [vmem:[%s572_s10 + $0x8] sm:$0xff] %vm591_vm0, %v1830_v51 }
 0xab0   : > { %1835 = vst.msk [vmem:[%s579_s18] sm:$0xff] %vm591_vm0, %v1833_v61 }
 0xab1   : > { %2591 = shalt.err (!%p2588_p10)
}
 0xab2   : > { %s2699_s17 = smov 128   ;;  %v1826_v62 = vpop.f32.mrf.mxu3  ;;  %s1872_s8 = sshll.u32 %s579_s18, 4  ;;  %v2383_v0 = vld [vmem:[%s2924_s13 + $0x8] sm:$0xff]  ;;  %s1873_s8 = int_to_ptr.vmem [resolvable:$true] %s1872_s8 }
 0xab3   : > { %2164 = dma.vmem_to_hbm [thread:$0]  (%p2853_p0), %s1856_s27, 256, %s1858_s22, %s1838_s16, %s2699_s17, %s2699_s17, %s2696_s19   ;;  %v1827_v63 = vadd.f32 %v2305_v35, %v1826_v62 }
 0xab4   : > { %s1874_s0 = sshll.u32 %s1871_s21, 4  ;;  %s1843_s6 = scalar_lea.sflag [#allocation15], %s2909_s4  ;;  %s1875_s0 = int_to_ptr.hbm [resolvable:$true] %s1874_s0 }
 0xab5   : > { %v1834_v1 = vadd.f32 %v2383_v0, %v1827_v63  ;;  %s2606_s20 = sshra.s32 %s1875_s0, 4  ;;  %s2612_s22 = scalar_lea.hbm %s3365_s14, 64  ;;  %s2607_s20 = int_to_ptr.hbm [resolvable:$true] %s2606_s20 }
 0xab6   : > { %s2608_s25 = scalar_lea.hbm %s2607_s20, 16  ;;  %p2613_p3 = scmp.lt.s32.totalorder %s2607_s20, %s3365_s14 }
 0xab7   : > { %1836 = vst.msk [vmem:[%s579_s18 + $0x8] sm:$0xff] %vm591_vm0, %v1834_v1  ;;  %p2609_p11 = scmp.ne.s32.totalorder %s2607_s20, %s2608_s25  ;;  %p2614_p5 = scmp.lt.s32.totalorder %s2612_s22, %s2608_s25 }
 0xab9   : > { %p2610_p12 = pnand %p2609_p11, %p2853_p0  ;;  %p2615_p1 = por %p2614_p5, %p2613_p3 }
 0xabb   : > { %p2611_p13 = pneg %p2610_p12 }
 0xabd   : > { %p2616_p4 = pnand %p2615_p1, %p2611_p13 }
 0xabf   : > { %2619 = shalt.err (!%p2616_p4)
}
 0xac0   : > { %2165 = dma.vmem_to_hbm [thread:$0]  (%p2853_p0), %s1873_s8, 256, %s1875_s0, %s1843_s6, %s2699_s17, %s2699_s17, %s2696_s19  }
 0xac1 PF: > { %s3366_s4 = sld [smem:[#allocation23_spill]]  ;;  %p2204_p8 = scmp.ge.s32.totalorder %s2678_s28, 2 }
 0xac3   : > { %p2189_p2 = pnand %p2204_p8, %p2805_p6 }
 0xac5   : > { %p2190_p9 = pneg %p2189_p2 }
 0xac7   : > { %s1889_s18 = sand.u32 1, %s3366_s4  }
 0xac8   : > { %s1890_s15 = scalar_lea.sflag [#allocation4], %s1889_s18 }
 0xac9   : > { %2657 = dma.done.wait (%p2190_p9), %s1890_s15, 256  }
 0xaca   : > { %2659 = vsyncadd (%p2190_p9), %s1890_s15, 4294967040  ;;  %s1900_s23 = scalar_lea.sflag [#allocation15], %s1889_s18 }
 0xacb   : > { %2661 = dma.done.wait (%p2190_p9), %s1900_s23, 256  }
 0xacc   : > { %2663 = vsyncadd (%p2190_p9), %s1900_s23, 4294967040  ;;  %s3368_s28 = sld [smem:[#allocation26_spill]]  ;;  %s3371_s25 = smov %s2670_s26 }
 0xacd   : > { %s3369_s29 = sld [smem:[#allocation24_spill]] }
 0xace   : > { %s3370_s27 = sld [smem:[#allocation28_spill]] }
 0xad2   : > { %p35_p0 = scmp.ge.s32.totalorder %s3368_s28, 6  }
 0xad3   : > { %s3372_s26 = smov %s3369_s29 }
 0xad4   :  { %37 = sbr.rel (!%p35_p0) target bundleno = 18 (0x12), region = 159 }
 0xad9   :  { %1906 = vsyncpa [#allocation3], 1 }
 0xada   :  { %1908 = vsyncpa [#allocation3 + $0x1], 1 }
 0xadb   :  { %1909 = vsyncpa [#allocation6], 1 }
 0xadc   :  { %1911 = vsyncpa [#allocation6 + $0x1], 1 }
 0xadd   :  { %1912 = vsyncpa [#allocation9], 1 }
 0xade   :  { %1913 = vsyncpa [#allocation12], 1 }
 0xadf   :  { %1914 = vsyncpa [#allocation4], 1 }
 0xae0   :  { %1916 = vsyncpa [#allocation4 + $0x1], 1 }
 0xae1   :  { %1917 = vsyncpa [#allocation15], 1 }
 0xae2   :  { %1919 = vsyncpa [#allocation15 + $0x1], 1 }

</bundles_post_ra>
